<compile_context>
chip_gen: v7x
topology: tpu7x:2x2x1
jax: 0.10.0
libtpu: 0.0.40
codegen_flags: <defaults>
</compile_context>

<pallas_src>
import math

import numpy as np

import jax
import jax.numpy as jnp
from jax.experimental import pallas as pl
from jax.experimental.pallas import tpu as pltpu

BN_EPS = 1e-5
LANE = 128  # one 128-lane half per pre-pool x parity (even / odd)


# ---------------------------------------------------------------------------
# Host-side weight re-layout (pure parameter plumbing, done once).
# ---------------------------------------------------------------------------
def _banded_conv_weight(w, win, in_rows):
    """Banded per-dy weight matrices turning conv-over-W into a matmul.

    w:       (Cout, Cin, 5, 5) conv weight (torch OIHW layout).
    win:     input spatial width per channel.
    in_rows: K of the matmul = (padded) Cin*win input-column count.

    out[dy, ci*win + xi, s*LANE + co*(wout//2) + X] = w[co, ci, dy, xi-(2X+s)]
    (zero outside the 5-tap band / pad rows / pad cols), so conv output
    x = 2X+s lands in lane-half s and the 2x2 W-pool is max(half0, half1).
    """
    cout, cin, kh, kw = w.shape
    wout = win - kw + 1
    xp = wout // 2

    col = np.arange(2 * LANE)
    s, rem = col // LANE, col % LANE
    col_ok = rem < cout * xp
    co = np.minimum(rem // xp, cout - 1)
    xo = 2 * (rem % xp) + s                              # pre-pool output x

    row = np.arange(in_rows)
    row_ok = row < cin * win
    ci = np.minimum(row // win, cin - 1)
    xi = row % win

    dx = xi[None, :, None] - xo[None, None, :]           # (1, in_rows, 2*LANE)
    ok = (row_ok[None, :, None] & col_ok[None, None, :]
          & (dx >= 0) & (dx < kw))
    dyb = np.broadcast_to(np.arange(kh)[:, None, None], (kh, in_rows, 2 * LANE))
    vals = w[co[None, None, :], ci[None, :, None], dyb, np.clip(dx, 0, kw - 1)]
    return jnp.where(ok, vals, 0.0).astype(jnp.float32)  # (5, in_rows, 256)


def _fc_weight_blocks(fc_w):
    """(4, LANE, 50): block[y2, co*4 + x2, k] = fc_w[k, co*16 + y2*4 + x2]."""
    row = np.arange(LANE)
    row_ok = row < 80
    co = np.minimum(row // 4, 19)
    x2 = row % 4
    blocks = []
    for y2 in range(4):
        feat = np.clip(co * 16 + y2 * 4 + x2, 0, 319)
        blk = jnp.where(row_ok[:, None], fc_w[:, feat].T, 0.0)
        blocks.append(blk)
    return jnp.stack(blocks).astype(jnp.float32)


def _chan_expand(channels, group):
    """0/1 (channels, LANE) mask: row c marks columns [c*group, (c+1)*group)."""
    col = np.arange(LANE)
    ch = np.where(col < channels * group, col // group, -1)
    return jnp.asarray((np.arange(channels)[:, None] == ch[None, :])
                       .astype(np.float32))


def prepare_params(params):
    """One-time re-layout of the PyTorch-style parameters for the kernel."""
    e1 = _chan_expand(10, 12)          # conv1/bn1 columns: ci*12 + X
    e2 = _chan_expand(20, 4)           # conv2/bn2 columns: co*4  + X2
    col = lambda v: v.reshape(-1, 1).astype(jnp.float32)
    row = lambda v: v.reshape(1, -1).astype(jnp.float32)
    return dict(
        w1=_banded_conv_weight(params["conv1_w"], win=28, in_rows=28).astype(jnp.bfloat16),
        w2=_banded_conv_weight(params["conv2_w"], win=12, in_rows=LANE).astype(jnp.bfloat16),
        wfc=_fc_weight_blocks(params["fc_w"]).astype(jnp.bfloat16),
        cb1=(params["conv1_b"].astype(jnp.float32) @ e1).reshape(1, LANE),
        cb2=(params["conv2_b"].astype(jnp.float32) @ e2).reshape(1, LANE),
        fcb=row(params["fc_b"]),
        g1=col(params["bn1_g"]), be1=col(params["bn1_b"]),
        g2=col(params["bn2_g"]), be2=col(params["bn2_b"]),
        g3=row(params["bn3_g"]), be3=row(params["bn3_b"]),
        e1=e1, e2=e2,
    )


# ---------------------------------------------------------------------------
# In-kernel helpers
# ---------------------------------------------------------------------------
def _pool_rows2(t, b):
    """Max over adjacent y (row blocks of size b); rows are ordered (y, batch)."""
    r, c = t.shape
    t = t.reshape(r // (2 * b), 2, b, c)
    return jnp.maximum(t[:, 0], t[:, 1]).reshape(r // 2, c)


def _batchnorm_cols(y, g_ref, b_ref, e_ref, n):
    """Training-mode BatchNorm over channel-major column groups (all f32).

    y: (rows, LANE); e_ref row c is the 0/1 mask of channel c's columns.
    Stats are taken over rows x that channel's columns (= N*H*W per channel).
    """
    e = e_ref[...]                                              # (C, LANE)
    inv_n = 1.0 / float(n)
    col_sum = jnp.sum(y, axis=0, keepdims=True)                 # (1, LANE)
    ch_mean = jnp.sum(col_sum * e, axis=1, keepdims=True) * inv_n      # (C, 1)
    mean_cols = jnp.sum(ch_mean * e, axis=0, keepdims=True)     # (1, LANE)
    cen = y - mean_cols
    col_sq = jnp.sum(cen * cen, axis=0, keepdims=True)
    ch_var = jnp.sum(col_sq * e, axis=1, keepdims=True) * inv_n         # biased
    scale = g_ref[...] * jax.lax.rsqrt(ch_var + BN_EPS)         # (C, 1)
    scale_cols = jnp.sum(scale * e, axis=0, keepdims=True)
    shift_cols = jnp.sum(b_ref[...] * e, axis=0, keepdims=True)
    return cen * scale_cols + shift_cols


# ---------------------------------------------------------------------------
# Fused LeNet-encoder kernel
# ---------------------------------------------------------------------------
def _lenet_enc_kernel(x_ref, w1_ref, w2_ref, wfc_ref, cb1_ref, cb2_ref, fcb_ref,
                      g1_ref, be1_ref, g2_ref, be2_ref, g3_ref, be3_ref,
                      e1_ref, e2_ref, o_ref):
    B = x_ref.shape[0] // 28

    # ---- conv1 (1->10, k=5): 5 accumulated MXU matmuls over dy against banded
    #      weights; rows = (y_out, b), lane-half 0/1 = even/odd output x.
    x = x_ref[...].astype(jnp.bfloat16)                         # (28B, 28)
    h1 = jnp.zeros((24 * B, 2 * LANE), jnp.float32)
    for dy in range(5):
        h1 += jnp.dot(x[dy * B:(dy + 24) * B, :], w1_ref[dy],
                      preferred_element_type=jnp.float32)

    # ---- 2x2 max-pool (H via sublane blocks, W via the two lane halves),
    #      bias (moved after the pool - commutes with max), ReLU, BatchNorm2d(10).
    a1 = _pool_rows2(h1, B)                                     # (12B, 256)
    a1 = jnp.maximum(a1[:, :LANE], a1[:, LANE:])                # (12B, 128): ci*12+X
    a1 = jnp.maximum(a1 + cb1_ref[...], 0.0)
    a1 = _batchnorm_cols(a1, g1_ref, be1_ref, e1_ref, n=B * 12 * 12)

    # ---- conv2 (10->20, k=5): same banded-matmul scheme, K = packed (ci, X).
    a1b = a1.astype(jnp.bfloat16)
    h2 = jnp.zeros((8 * B, 2 * LANE), jnp.float32)
    for dy in range(5):
        h2 += jnp.dot(a1b[dy * B:(dy + 8) * B, :], w2_ref[dy],
                      preferred_element_type=jnp.float32)
    # TODO(synk): nn.Dropout2d(p=0.2) acts here in train(); identity here.

    a2 = _pool_rows2(h2, B)                                     # (4B, 256)
    a2 = jnp.maximum(a2[:, :LANE], a2[:, LANE:])                # (4B, 128): co*4+X2
    a2 = jnp.maximum(a2 + cb2_ref[...], 0.0)
    a2 = _batchnorm_cols(a2, g2_ref, be2_ref, e2_ref, n=B * 4 * 4)

    # ---- fc(320->50): 4 accumulated matmuls over the Y2 row blocks (fc weight
    #      rows pre-permuted host-side to torch's x.view(-1, 320) order).
    a2b = a2.astype(jnp.bfloat16)
    z = jnp.zeros((B, 50), jnp.float32)
    for y2 in range(4):
        z += jnp.dot(a2b[y2 * B:(y2 + 1) * B, :], wfc_ref[y2],
                     preferred_element_type=jnp.float32)
    z = jnp.maximum(z + fcb_ref[...], 0.0)

    # ---- BatchNorm1d(50) over the batch rows.
    mean = jnp.sum(z, axis=0, keepdims=True) * (1.0 / B)
    cen = z - mean
    var = jnp.sum(cen * cen, axis=0, keepdims=True) * (1.0 / B)
    o_ref[...] = cen * (g3_ref[...] * jax.lax.rsqrt(var + BN_EPS)) + be3_ref[...]


# ---------------------------------------------------------------------------
# Wrapper: layout plumbing only, then one pallas_call.
# ---------------------------------------------------------------------------
def multi_lenet_enc_forward(prep, x_nchw):
    """x_nchw: (B, 1, 28, 28) float32 (PyTorch layout). Returns (B, 50)."""
    B = x_nchw.shape[0]
    assert tuple(x_nchw.shape[1:]) == (1, 28, 28), x_nchw.shape
    # Lane-dense input block: rows (y, batch), cols x (no trailing Cin=1 dim).
    x_mat = jnp.transpose(x_nchw[:, 0], (1, 0, 2)).reshape(28 * B, 28)
    x_mat = x_mat.astype(jnp.float32)

    inputs = (x_mat, prep["w1"], prep["w2"], prep["wfc"],
              prep["cb1"], prep["cb2"], prep["fcb"],
              prep["g1"], prep["be1"], prep["g2"], prep["be2"],
              prep["g3"], prep["be3"], prep["e1"], prep["e2"])

    return pl.pallas_call(
        _lenet_enc_kernel,
        out_shape=jax.ShapeDtypeStruct((B, 50), jnp.float32),
        in_specs=[pl.BlockSpec(memory_space=pltpu.MemorySpace.VMEM)] * len(inputs),
        out_specs=pl.BlockSpec(memory_space=pltpu.MemorySpace.VMEM),
        compiler_params=pltpu.CompilerParams(vmem_limit_bytes=32 * 1024 * 1024),
    )(*inputs)


# ---------------------------------------------------------------------------
# Pure-JAX f32 reference (training-mode BN, dropout as identity) for parity.
# ---------------------------------------------------------------------------
def reference_forward(params, x):
    hp = jax.lax.Precision.HIGHEST

    def conv(t, w, b):
        y = jax.lax.conv_general_dilated(
            t, w, (1, 1), "VALID",
            dimension_numbers=("NCHW", "OIHW", "NCHW"), precision=hp)
        return y + b.reshape(1, -1, 1, 1)

    def pool(t):
        return jax.lax.reduce_window(t, -jnp.inf, jax.lax.max,
                                     (1, 1, 2, 2), (1, 1, 2, 2), "VALID")

    def bn(t, g, b, axes):
        m = jnp.mean(t, axis=axes, keepdims=True)
        v = jnp.mean(jnp.square(t - m), axis=axes, keepdims=True)
        return (t - m) * jax.lax.rsqrt(v + BN_EPS) * g + b

    per_ch = lambda v: v.reshape(1, -1, 1, 1)
    h = jnp.maximum(pool(conv(x, params["conv1_w"], params["conv1_b"])), 0.0)
    h = bn(h, per_ch(params["bn1_g"]), per_ch(params["bn1_b"]), (0, 2, 3))
    h = conv(h, params["conv2_w"], params["conv2_b"])
    h = jnp.maximum(pool(h), 0.0)
    h = bn(h, per_ch(params["bn2_g"]), per_ch(params["bn2_b"]), (0, 2, 3))
    h = h.reshape(h.shape[0], -1)
    h = jnp.maximum(jnp.dot(h, params["fc_w"].T, precision=hp) + params["fc_b"], 0.0)
    return bn(h, params["bn3_g"], params["bn3_b"], (0,))


# ---------------------------------------------------------------------------
# Deterministic parameter init (matches torch defaults: U(+/- 1/sqrt(fan_in))).
# ---------------------------------------------------------------------------
def init_params(key):
    ks = jax.random.split(key, 6)

    def u(k, shape, fan_in):
        bound = 1.0 / math.sqrt(fan_in)
        return jax.random.uniform(k, shape, jnp.float32, -bound, bound)

    return {
        "conv1_w": u(ks[0], (10, 1, 5, 5), 25),   "conv1_b": u(ks[1], (10,), 25),
        "conv2_w": u(ks[2], (20, 10, 5, 5), 250), "conv2_b": u(ks[3], (20,), 250),
        "fc_w":    u(ks[4], (50, 320), 320),      "fc_b":    u(ks[5], (50,), 320),
        "bn1_g": jnp.ones((10,), jnp.float32), "bn1_b": jnp.zeros((10,), jnp.float32),
        "bn2_g": jnp.ones((20,), jnp.float32), "bn2_b": jnp.zeros((20,), jnp.float32),
        "bn3_g": jnp.ones((50,), jnp.float32), "bn3_b": jnp.zeros((50,), jnp.float32),
    }


if __name__ == "__main__":
    key = jax.random.PRNGKey(0)
    pkey, xkey = jax.random.split(key)
    params = init_params(pkey)
    # LeNet-5 encoder implies 1-channel 28x28 input (fc expects 20*4*4 = 320);
    # B=8 matches the 8-row sublane tile.
    x = jax.random.normal(xkey, (8, 1, 28, 28), jnp.float32)

    prep = prepare_params(params)                  # one-time weight re-layout
    fwd = jax.jit(lambda inp: multi_lenet_enc_forward(prep, inp))
    out = jax.block_until_ready(fwd(x))

    assert out.shape == (8, 50), out.shape
    assert bool(jnp.all(jnp.isfinite(out)))

    # Parity vs. an f32 reference: bf16 MXU matmuls give ~1e-2-level deltas;
    # the median / 95%-quantile criterion tolerates the rare BN3 small-batch
    # variance amplification while still catching any real layout bug.
    ref = reference_forward(params, x)
    err = jnp.abs(out - ref)
    assert float(jnp.median(err)) < 0.05, float(jnp.median(err))
    assert float(jnp.mean((err < 0.25).astype(jnp.float32))) > 0.95, float(jnp.max(err))

    print("KERNEL_OK")
</pallas_src>

<mosaic_0001>
module attributes {stable_mosaic.version = 11 : i64} {
  func.func @_lenet_enc_kernel(%arg0: memref<224x28xf32, #tpu.memory_space<vmem>>, %arg1: memref<5x28x256xbf16, #tpu.memory_space<vmem>>, %arg2: memref<5x128x256xbf16, #tpu.memory_space<vmem>>, %arg3: memref<4x128x50xbf16, #tpu.memory_space<vmem>>, %arg4: memref<1x128xf32, #tpu.memory_space<vmem>>, %arg5: memref<1x128xf32, #tpu.memory_space<vmem>>, %arg6: memref<1x50xf32, #tpu.memory_space<vmem>>, %arg7: memref<10x1xf32, #tpu.memory_space<vmem>>, %arg8: memref<10x1xf32, #tpu.memory_space<vmem>>, %arg9: memref<20x1xf32, #tpu.memory_space<vmem>>, %arg10: memref<20x1xf32, #tpu.memory_space<vmem>>, %arg11: memref<1x50xf32, #tpu.memory_space<vmem>>, %arg12: memref<1x50xf32, #tpu.memory_space<vmem>>, %arg13: memref<10x128xf32, #tpu.memory_space<vmem>>, %arg14: memref<20x128xf32, #tpu.memory_space<vmem>>, %arg15: memref<8x50xf32, #tpu.memory_space<vmem>>) attributes {dimension_semantics = [], scalar_prefetch = 0 : i64, scratch_operands = 0 : i64, tpu.core_type = #tpu.core_type<tc>} {
    %c0 = arith.constant 0 : index
    %c0_0 = arith.constant 0 : index
    %0 = vector.load %arg0[%c0, %c0_0] : memref<224x28xf32, #tpu.memory_space<vmem>>, vector<224x28xf32>
    %1 = arith.truncf %0 : vector<224x28xf32> to vector<224x28xbf16>
    %cst = arith.constant 0.000000e+00 : f32
    %2 = vector.broadcast %cst : f32 to vector<192x256xf32>
    %3 = vector.extract_strided_slice %1 {offsets = [0, 0], sizes = [192, 28], strides = [1, 1]} : vector<224x28xbf16> to vector<192x28xbf16>
    %c0_1 = arith.constant 0 : index
    %c0_2 = arith.constant 0 : index
    %c0_3 = arith.constant 0 : index
    %4 = vector.load %arg1[%c0_1, %c0_2, %c0_3] : memref<5x28x256xbf16, #tpu.memory_space<vmem>>, vector<1x28x256xbf16>
    %5 = vector.shape_cast %4 : vector<1x28x256xbf16> to vector<28x256xbf16>
    %cst_4 = arith.constant dense<0.000000e+00> : vector<192x256xf32>
    %6 = tpu.matmul %3, %5, %cst_4 {dimension_numbers = #tpu.dot_dimension_numbers<[1], [0], [0], [1], [0, 0, 1, 1], [], []>} : vector<192x28xbf16>, vector<28x256xbf16>, vector<192x256xf32> -> vector<192x256xf32>
    %7 = arith.addf %2, %6 : vector<192x256xf32>
    %8 = vector.extract_strided_slice %1 {offsets = [8, 0], sizes = [192, 28], strides = [1, 1]} : vector<224x28xbf16> to vector<192x28xbf16>
    %c1 = arith.constant 1 : index
    %c0_5 = arith.constant 0 : index
    %c0_6 = arith.constant 0 : index
    %9 = vector.load %arg1[%c1, %c0_5, %c0_6] : memref<5x28x256xbf16, #tpu.memory_space<vmem>>, vector<1x28x256xbf16>
    %10 = vector.shape_cast %9 : vector<1x28x256xbf16> to vector<28x256xbf16>
    %cst_7 = arith.constant dense<0.000000e+00> : vector<192x256xf32>
    %11 = tpu.matmul %8, %10, %cst_7 {dimension_numbers = #tpu.dot_dimension_numbers<[1], [0], [0], [1], [0, 0, 1, 1], [], []>} : vector<192x28xbf16>, vector<28x256xbf16>, vector<192x256xf32> -> vector<192x256xf32>
    %12 = arith.addf %7, %11 : vector<192x256xf32>
    %13 = vector.extract_strided_slice %1 {offsets = [16, 0], sizes = [192, 28], strides = [1, 1]} : vector<224x28xbf16> to vector<192x28xbf16>
    %c2 = arith.constant 2 : index
    %c0_8 = arith.constant 0 : index
    %c0_9 = arith.constant 0 : index
    %14 = vector.load %arg1[%c2, %c0_8, %c0_9] : memref<5x28x256xbf16, #tpu.memory_space<vmem>>, vector<1x28x256xbf16>
    %15 = vector.shape_cast %14 : vector<1x28x256xbf16> to vector<28x256xbf16>
    %cst_10 = arith.constant dense<0.000000e+00> : vector<192x256xf32>
    %16 = tpu.matmul %13, %15, %cst_10 {dimension_numbers = #tpu.dot_dimension_numbers<[1], [0], [0], [1], [0, 0, 1, 1], [], []>} : vector<192x28xbf16>, vector<28x256xbf16>, vector<192x256xf32> -> vector<192x256xf32>
    %17 = arith.addf %12, %16 : vector<192x256xf32>
    %18 = vector.extract_strided_slice %1 {offsets = [24, 0], sizes = [192, 28], strides = [1, 1]} : vector<224x28xbf16> to vector<192x28xbf16>
    %c3 = arith.constant 3 : index
    %c0_11 = arith.constant 0 : index
    %c0_12 = arith.constant 0 : index
    %19 = vector.load %arg1[%c3, %c0_11, %c0_12] : memref<5x28x256xbf16, #tpu.memory_space<vmem>>, vector<1x28x256xbf16>
    %20 = vector.shape_cast %19 : vector<1x28x256xbf16> to vector<28x256xbf16>
    %cst_13 = arith.constant dense<0.000000e+00> : vector<192x256xf32>
    %21 = tpu.matmul %18, %20, %cst_13 {dimension_numbers = #tpu.dot_dimension_numbers<[1], [0], [0], [1], [0, 0, 1, 1], [], []>} : vector<192x28xbf16>, vector<28x256xbf16>, vector<192x256xf32> -> vector<192x256xf32>
    %22 = arith.addf %17, %21 : vector<192x256xf32>
    %23 = vector.extract_strided_slice %1 {offsets = [32, 0], sizes = [192, 28], strides = [1, 1]} : vector<224x28xbf16> to vector<192x28xbf16>
    %c4 = arith.constant 4 : index
    %c0_14 = arith.constant 0 : index
    %c0_15 = arith.constant 0 : index
    %24 = vector.load %arg1[%c4, %c0_14, %c0_15] : memref<5x28x256xbf16, #tpu.memory_space<vmem>>, vector<1x28x256xbf16>
    %25 = vector.shape_cast %24 : vector<1x28x256xbf16> to vector<28x256xbf16>
    %cst_16 = arith.constant dense<0.000000e+00> : vector<192x256xf32>
    %26 = tpu.matmul %23, %25, %cst_16 {dimension_numbers = #tpu.dot_dimension_numbers<[1], [0], [0], [1], [0, 0, 1, 1], [], []>} : vector<192x28xbf16>, vector<28x256xbf16>, vector<192x256xf32> -> vector<192x256xf32>
    %27 = arith.addf %22, %26 : vector<192x256xf32>
    %28 = vector.shape_cast %27 : vector<192x256xf32> to vector<12x2x8x256xf32>
    %29 = vector.extract_strided_slice %28 {offsets = [0, 0, 0, 0], sizes = [12, 1, 8, 256], strides = [1, 1, 1, 1]} : vector<12x2x8x256xf32> to vector<12x1x8x256xf32>
    %30 = vector.shape_cast %29 : vector<12x1x8x256xf32> to vector<12x8x256xf32>
    %31 = vector.extract_strided_slice %28 {offsets = [0, 1, 0, 0], sizes = [12, 1, 8, 256], strides = [1, 1, 1, 1]} : vector<12x2x8x256xf32> to vector<12x1x8x256xf32>
    %32 = vector.shape_cast %31 : vector<12x1x8x256xf32> to vector<12x8x256xf32>
    %33 = arith.maximumf %30, %32 : vector<12x8x256xf32>
    %34 = vector.shape_cast %33 : vector<12x8x256xf32> to vector<96x256xf32>
    %35 = vector.extract_strided_slice %34 {offsets = [0, 0], sizes = [96, 128], strides = [1, 1]} : vector<96x256xf32> to vector<96x128xf32>
    %36 = vector.extract_strided_slice %34 {offsets = [0, 128], sizes = [96, 128], strides = [1, 1]} : vector<96x256xf32> to vector<96x128xf32>
    %37 = arith.maximumf %35, %36 : vector<96x128xf32>
    %c0_17 = arith.constant 0 : index
    %c0_18 = arith.constant 0 : index
    %38 = vector.load %arg4[%c0_17, %c0_18] : memref<1x128xf32, #tpu.memory_space<vmem>>, vector<1x128xf32>
    %39 = vector.broadcast %38 : vector<1x128xf32> to vector<96x128xf32>
    %40 = arith.addf %37, %39 : vector<96x128xf32>
    %cst_19 = arith.constant 0.000000e+00 : f32
    %41 = vector.broadcast %cst_19 : f32 to vector<96x128xf32>
    %42 = arith.maximumf %40, %41 : vector<96x128xf32>
    %c0_20 = arith.constant 0 : index
    %c0_21 = arith.constant 0 : index
    %43 = vector.load %arg13[%c0_20, %c0_21] : memref<10x128xf32, #tpu.memory_space<vmem>>, vector<10x128xf32>
    %cst_22 = arith.constant dense<0.000000e+00> : vector<128xf32>
    %44 = vector.multi_reduction <add>, %42, %cst_22 [0] : vector<96x128xf32> to vector<128xf32>
    %45 = vector.shape_cast %44 : vector<128xf32> to vector<1x128xf32>
    %46 = vector.broadcast %45 : vector<1x128xf32> to vector<10x128xf32>
    %47 = arith.mulf %46, %43 : vector<10x128xf32>
    %cst_23 = arith.constant dense<0.000000e+00> : vector<10xf32>
    %48 = vector.multi_reduction <add>, %47, %cst_23 [1] : vector<10x128xf32> to vector<10xf32>
    %49 = vector.shape_cast %48 : vector<10xf32> to vector<10x1xf32>
    %cst_24 = arith.constant 8.68055562E-4 : f32
    %50 = vector.broadcast %cst_24 : f32 to vector<10x1xf32>
    %51 = arith.mulf %49, %50 : vector<10x1xf32>
    %52 = vector.broadcast %51 : vector<10x1xf32> to vector<10x128xf32>
    %53 = arith.mulf %52, %43 : vector<10x128xf32>
    %cst_25 = arith.constant dense<0.000000e+00> : vector<128xf32>
    %54 = vector.multi_reduction <add>, %53, %cst_25 [0] : vector<10x128xf32> to vector<128xf32>
    %55 = vector.shape_cast %54 : vector<128xf32> to vector<1x128xf32>
    %56 = vector.broadcast %55 : vector<1x128xf32> to vector<96x128xf32>
    %57 = arith.subf %42, %56 : vector<96x128xf32>
    %58 = arith.mulf %57, %57 : vector<96x128xf32>
    %cst_26 = arith.constant dense<0.000000e+00> : vector<128xf32>
    %59 = vector.multi_reduction <add>, %58, %cst_26 [0] : vector<96x128xf32> to vector<128xf32>
    %60 = vector.shape_cast %59 : vector<128xf32> to vector<1x128xf32>
    %61 = vector.broadcast %60 : vector<1x128xf32> to vector<10x128xf32>
    %62 = arith.mulf %61, %43 : vector<10x128xf32>
    %cst_27 = arith.constant dense<0.000000e+00> : vector<10xf32>
    %63 = vector.multi_reduction <add>, %62, %cst_27 [1] : vector<10x128xf32> to vector<10xf32>
    %64 = vector.shape_cast %63 : vector<10xf32> to vector<10x1xf32>
    %cst_28 = arith.constant 8.68055562E-4 : f32
    %65 = vector.broadcast %cst_28 : f32 to vector<10x1xf32>
    %66 = arith.mulf %64, %65 : vector<10x1xf32>
    %c0_29 = arith.constant 0 : index
    %c0_30 = arith.constant 0 : index
    %67 = vector.load %arg7[%c0_29, %c0_30] : memref<10x1xf32, #tpu.memory_space<vmem>>, vector<10x1xf32>
    %cst_31 = arith.constant 9.99999974E-6 : f32
    %68 = vector.broadcast %cst_31 : f32 to vector<10x1xf32>
    %69 = arith.addf %66, %68 : vector<10x1xf32>
    %70 = math.rsqrt %69 : vector<10x1xf32>
    %71 = arith.mulf %67, %70 : vector<10x1xf32>
    %72 = vector.broadcast %71 : vector<10x1xf32> to vector<10x128xf32>
    %73 = arith.mulf %72, %43 : vector<10x128xf32>
    %cst_32 = arith.constant dense<0.000000e+00> : vector<128xf32>
    %74 = vector.multi_reduction <add>, %73, %cst_32 [0] : vector<10x128xf32> to vector<128xf32>
    %75 = vector.shape_cast %74 : vector<128xf32> to vector<1x128xf32>
    %c0_33 = arith.constant 0 : index
    %c0_34 = arith.constant 0 : index
    %76 = vector.load %arg8[%c0_33, %c0_34] : memref<10x1xf32, #tpu.memory_space<vmem>>, vector<10x1xf32>
    %77 = vector.broadcast %76 : vector<10x1xf32> to vector<10x128xf32>
    %78 = arith.mulf %77, %43 : vector<10x128xf32>
    %cst_35 = arith.constant dense<0.000000e+00> : vector<128xf32>
    %79 = vector.multi_reduction <add>, %78, %cst_35 [0] : vector<10x128xf32> to vector<128xf32>
    %80 = vector.shape_cast %79 : vector<128xf32> to vector<1x128xf32>
    %81 = vector.broadcast %75 : vector<1x128xf32> to vector<96x128xf32>
    %82 = arith.mulf %57, %81 : vector<96x128xf32>
    %83 = vector.broadcast %80 : vector<1x128xf32> to vector<96x128xf32>
    %84 = arith.addf %82, %83 : vector<96x128xf32>
    %85 = arith.truncf %84 : vector<96x128xf32> to vector<96x128xbf16>
    %cst_36 = arith.constant 0.000000e+00 : f32
    %86 = vector.broadcast %cst_36 : f32 to vector<64x256xf32>
    %87 = vector.extract_strided_slice %85 {offsets = [0, 0], sizes = [64, 128], strides = [1, 1]} : vector<96x128xbf16> to vector<64x128xbf16>
    %c0_37 = arith.constant 0 : index
    %c0_38 = arith.constant 0 : index
    %c0_39 = arith.constant 0 : index
    %88 = vector.load %arg2[%c0_37, %c0_38, %c0_39] : memref<5x128x256xbf16, #tpu.memory_space<vmem>>, vector<1x128x256xbf16>
    %89 = vector.shape_cast %88 : vector<1x128x256xbf16> to vector<128x256xbf16>
    %cst_40 = arith.constant dense<0.000000e+00> : vector<64x256xf32>
    %90 = tpu.matmul %87, %89, %cst_40 {dimension_numbers = #tpu.dot_dimension_numbers<[1], [0], [0], [1], [0, 0, 1, 1], [], []>} : vector<64x128xbf16>, vector<128x256xbf16>, vector<64x256xf32> -> vector<64x256xf32>
    %91 = arith.addf %86, %90 : vector<64x256xf32>
    %92 = vector.extract_strided_slice %85 {offsets = [8, 0], sizes = [64, 128], strides = [1, 1]} : vector<96x128xbf16> to vector<64x128xbf16>
    %c1_41 = arith.constant 1 : index
    %c0_42 = arith.constant 0 : index
    %c0_43 = arith.constant 0 : index
    %93 = vector.load %arg2[%c1_41, %c0_42, %c0_43] : memref<5x128x256xbf16, #tpu.memory_space<vmem>>, vector<1x128x256xbf16>
    %94 = vector.shape_cast %93 : vector<1x128x256xbf16> to vector<128x256xbf16>
    %cst_44 = arith.constant dense<0.000000e+00> : vector<64x256xf32>
    %95 = tpu.matmul %92, %94, %cst_44 {dimension_numbers = #tpu.dot_dimension_numbers<[1], [0], [0], [1], [0, 0, 1, 1], [], []>} : vector<64x128xbf16>, vector<128x256xbf16>, vector<64x256xf32> -> vector<64x256xf32>
    %96 = arith.addf %91, %95 : vector<64x256xf32>
    %97 = vector.extract_strided_slice %85 {offsets = [16, 0], sizes = [64, 128], strides = [1, 1]} : vector<96x128xbf16> to vector<64x128xbf16>
    %c2_45 = arith.constant 2 : index
    %c0_46 = arith.constant 0 : index
    %c0_47 = arith.constant 0 : index
    %98 = vector.load %arg2[%c2_45, %c0_46, %c0_47] : memref<5x128x256xbf16, #tpu.memory_space<vmem>>, vector<1x128x256xbf16>
    %99 = vector.shape_cast %98 : vector<1x128x256xbf16> to vector<128x256xbf16>
    %cst_48 = arith.constant dense<0.000000e+00> : vector<64x256xf32>
    %100 = tpu.matmul %97, %99, %cst_48 {dimension_numbers = #tpu.dot_dimension_numbers<[1], [0], [0], [1], [0, 0, 1, 1], [], []>} : vector<64x128xbf16>, vector<128x256xbf16>, vector<64x256xf32> -> vector<64x256xf32>
    %101 = arith.addf %96, %100 : vector<64x256xf32>
    %102 = vector.extract_strided_slice %85 {offsets = [24, 0], sizes = [64, 128], strides = [1, 1]} : vector<96x128xbf16> to vector<64x128xbf16>
    %c3_49 = arith.constant 3 : index
    %c0_50 = arith.constant 0 : index
    %c0_51 = arith.constant 0 : index
    %103 = vector.load %arg2[%c3_49, %c0_50, %c0_51] : memref<5x128x256xbf16, #tpu.memory_space<vmem>>, vector<1x128x256xbf16>
    %104 = vector.shape_cast %103 : vector<1x128x256xbf16> to vector<128x256xbf16>
    %cst_52 = arith.constant dense<0.000000e+00> : vector<64x256xf32>
    %105 = tpu.matmul %102, %104, %cst_52 {dimension_numbers = #tpu.dot_dimension_numbers<[1], [0], [0], [1], [0, 0, 1, 1], [], []>} : vector<64x128xbf16>, vector<128x256xbf16>, vector<64x256xf32> -> vector<64x256xf32>
    %106 = arith.addf %101, %105 : vector<64x256xf32>
    %107 = vector.extract_strided_slice %85 {offsets = [32, 0], sizes = [64, 128], strides = [1, 1]} : vector<96x128xbf16> to vector<64x128xbf16>
    %c4_53 = arith.constant 4 : index
    %c0_54 = arith.constant 0 : index
    %c0_55 = arith.constant 0 : index
    %108 = vector.load %arg2[%c4_53, %c0_54, %c0_55] : memref<5x128x256xbf16, #tpu.memory_space<vmem>>, vector<1x128x256xbf16>
    %109 = vector.shape_cast %108 : vector<1x128x256xbf16> to vector<128x256xbf16>
    %cst_56 = arith.constant dense<0.000000e+00> : vector<64x256xf32>
    %110 = tpu.matmul %107, %109, %cst_56 {dimension_numbers = #tpu.dot_dimension_numbers<[1], [0], [0], [1], [0, 0, 1, 1], [], []>} : vector<64x128xbf16>, vector<128x256xbf16>, vector<64x256xf32> -> vector<64x256xf32>
    %111 = arith.addf %106, %110 : vector<64x256xf32>
    %112 = vector.shape_cast %111 : vector<64x256xf32> to vector<4x2x8x256xf32>
    %113 = vector.extract_strided_slice %112 {offsets = [0, 0, 0, 0], sizes = [4, 1, 8, 256], strides = [1, 1, 1, 1]} : vector<4x2x8x256xf32> to vector<4x1x8x256xf32>
    %114 = vector.shape_cast %113 : vector<4x1x8x256xf32> to vector<4x8x256xf32>
    %115 = vector.extract_strided_slice %112 {offsets = [0, 1, 0, 0], sizes = [4, 1, 8, 256], strides = [1, 1, 1, 1]} : vector<4x2x8x256xf32> to vector<4x1x8x256xf32>
    %116 = vector.shape_cast %115 : vector<4x1x8x256xf32> to vector<4x8x256xf32>
    %117 = arith.maximumf %114, %116 : vector<4x8x256xf32>
    %118 = vector.shape_cast %117 : vector<4x8x256xf32> to vector<32x256xf32>
    %119 = vector.extract_strided_slice %118 {offsets = [0, 0], sizes = [32, 128], strides = [1, 1]} : vector<32x256xf32> to vector<32x128xf32>
    %120 = vector.extract_strided_slice %118 {offsets = [0, 128], sizes = [32, 128], strides = [1, 1]} : vector<32x256xf32> to vector<32x128xf32>
    %121 = arith.maximumf %119, %120 : vector<32x128xf32>
    %c0_57 = arith.constant 0 : index
    %c0_58 = arith.constant 0 : index
    %122 = vector.load %arg5[%c0_57, %c0_58] : memref<1x128xf32, #tpu.memory_space<vmem>>, vector<1x128xf32>
    %123 = vector.broadcast %122 : vector<1x128xf32> to vector<32x128xf32>
    %124 = arith.addf %121, %123 : vector<32x128xf32>
    %cst_59 = arith.constant 0.000000e+00 : f32
    %125 = vector.broadcast %cst_59 : f32 to vector<32x128xf32>
    %126 = arith.maximumf %124, %125 : vector<32x128xf32>
    %c0_60 = arith.constant 0 : index
    %c0_61 = arith.constant 0 : index
    %127 = vector.load %arg14[%c0_60, %c0_61] : memref<20x128xf32, #tpu.memory_space<vmem>>, vector<20x128xf32>
    %cst_62 = arith.constant dense<0.000000e+00> : vector<128xf32>
    %128 = vector.multi_reduction <add>, %126, %cst_62 [0] : vector<32x128xf32> to vector<128xf32>
    %129 = vector.shape_cast %128 : vector<128xf32> to vector<1x128xf32>
    %130 = vector.broadcast %129 : vector<1x128xf32> to vector<20x128xf32>
    %131 = arith.mulf %130, %127 : vector<20x128xf32>
    %cst_63 = arith.constant dense<0.000000e+00> : vector<20xf32>
    %132 = vector.multi_reduction <add>, %131, %cst_63 [1] : vector<20x128xf32> to vector<20xf32>
    %133 = vector.shape_cast %132 : vector<20xf32> to vector<20x1xf32>
    %cst_64 = arith.constant 7.812500e-03 : f32
    %134 = vector.broadcast %cst_64 : f32 to vector<20x1xf32>
    %135 = arith.mulf %133, %134 : vector<20x1xf32>
    %136 = vector.broadcast %135 : vector<20x1xf32> to vector<20x128xf32>
    %137 = arith.mulf %136, %127 : vector<20x128xf32>
    %cst_65 = arith.constant dense<0.000000e+00> : vector<128xf32>
    %138 = vector.multi_reduction <add>, %137, %cst_65 [0] : vector<20x128xf32> to vector<128xf32>
    %139 = vector.shape_cast %138 : vector<128xf32> to vector<1x128xf32>
    %140 = vector.broadcast %139 : vector<1x128xf32> to vector<32x128xf32>
    %141 = arith.subf %126, %140 : vector<32x128xf32>
    %142 = arith.mulf %141, %141 : vector<32x128xf32>
    %cst_66 = arith.constant dense<0.000000e+00> : vector<128xf32>
    %143 = vector.multi_reduction <add>, %142, %cst_66 [0] : vector<32x128xf32> to vector<128xf32>
    %144 = vector.shape_cast %143 : vector<128xf32> to vector<1x128xf32>
    %145 = vector.broadcast %144 : vector<1x128xf32> to vector<20x128xf32>
    %146 = arith.mulf %145, %127 : vector<20x128xf32>
    %cst_67 = arith.constant dense<0.000000e+00> : vector<20xf32>
    %147 = vector.multi_reduction <add>, %146, %cst_67 [1] : vector<20x128xf32> to vector<20xf32>
    %148 = vector.shape_cast %147 : vector<20xf32> to vector<20x1xf32>
    %cst_68 = arith.constant 7.812500e-03 : f32
    %149 = vector.broadcast %cst_68 : f32 to vector<20x1xf32>
    %150 = arith.mulf %148, %149 : vector<20x1xf32>
    %c0_69 = arith.constant 0 : index
    %c0_70 = arith.constant 0 : index
    %151 = vector.load %arg9[%c0_69, %c0_70] : memref<20x1xf32, #tpu.memory_space<vmem>>, vector<20x1xf32>
    %cst_71 = arith.constant 9.99999974E-6 : f32
    %152 = vector.broadcast %cst_71 : f32 to vector<20x1xf32>
    %153 = arith.addf %150, %152 : vector<20x1xf32>
    %154 = math.rsqrt %153 : vector<20x1xf32>
    %155 = arith.mulf %151, %154 : vector<20x1xf32>
    %156 = vector.broadcast %155 : vector<20x1xf32> to vector<20x128xf32>
    %157 = arith.mulf %156, %127 : vector<20x128xf32>
    %cst_72 = arith.constant dense<0.000000e+00> : vector<128xf32>
    %158 = vector.multi_reduction <add>, %157, %cst_72 [0] : vector<20x128xf32> to vector<128xf32>
    %159 = vector.shape_cast %158 : vector<128xf32> to vector<1x128xf32>
    %c0_73 = arith.constant 0 : index
    %c0_74 = arith.constant 0 : index
    %160 = vector.load %arg10[%c0_73, %c0_74] : memref<20x1xf32, #tpu.memory_space<vmem>>, vector<20x1xf32>
    %161 = vector.broadcast %160 : vector<20x1xf32> to vector<20x128xf32>
    %162 = arith.mulf %161, %127 : vector<20x128xf32>
    %cst_75 = arith.constant dense<0.000000e+00> : vector<128xf32>
    %163 = vector.multi_reduction <add>, %162, %cst_75 [0] : vector<20x128xf32> to vector<128xf32>
    %164 = vector.shape_cast %163 : vector<128xf32> to vector<1x128xf32>
    %165 = vector.broadcast %159 : vector<1x128xf32> to vector<32x128xf32>
    %166 = arith.mulf %141, %165 : vector<32x128xf32>
    %167 = vector.broadcast %164 : vector<1x128xf32> to vector<32x128xf32>
    %168 = arith.addf %166, %167 : vector<32x128xf32>
    %169 = arith.truncf %168 : vector<32x128xf32> to vector<32x128xbf16>
    %cst_76 = arith.constant 0.000000e+00 : f32
    %170 = vector.broadcast %cst_76 : f32 to vector<8x50xf32>
    %171 = vector.extract_strided_slice %169 {offsets = [0, 0], sizes = [8, 128], strides = [1, 1]} : vector<32x128xbf16> to vector<8x128xbf16>
    %c0_77 = arith.constant 0 : index
    %c0_78 = arith.constant 0 : index
    %c0_79 = arith.constant 0 : index
    %172 = vector.load %arg3[%c0_77, %c0_78, %c0_79] : memref<4x128x50xbf16, #tpu.memory_space<vmem>>, vector<1x128x50xbf16>
    %173 = vector.shape_cast %172 : vector<1x128x50xbf16> to vector<128x50xbf16>
    %cst_80 = arith.constant dense<0.000000e+00> : vector<8x50xf32>
    %174 = tpu.matmul %171, %173, %cst_80 {dimension_numbers = #tpu.dot_dimension_numbers<[1], [0], [0], [1], [0, 0, 1, 1], [], []>} : vector<8x128xbf16>, vector<128x50xbf16>, vector<8x50xf32> -> vector<8x50xf32>
    %175 = arith.addf %170, %174 : vector<8x50xf32>
    %176 = vector.extract_strided_slice %169 {offsets = [8, 0], sizes = [8, 128], strides = [1, 1]} : vector<32x128xbf16> to vector<8x128xbf16>
    %c1_81 = arith.constant 1 : index
    %c0_82 = arith.constant 0 : index
    %c0_83 = arith.constant 0 : index
    %177 = vector.load %arg3[%c1_81, %c0_82, %c0_83] : memref<4x128x50xbf16, #tpu.memory_space<vmem>>, vector<1x128x50xbf16>
    %178 = vector.shape_cast %177 : vector<1x128x50xbf16> to vector<128x50xbf16>
    %cst_84 = arith.constant dense<0.000000e+00> : vector<8x50xf32>
    %179 = tpu.matmul %176, %178, %cst_84 {dimension_numbers = #tpu.dot_dimension_numbers<[1], [0], [0], [1], [0, 0, 1, 1], [], []>} : vector<8x128xbf16>, vector<128x50xbf16>, vector<8x50xf32> -> vector<8x50xf32>
    %180 = arith.addf %175, %179 : vector<8x50xf32>
    %181 = vector.extract_strided_slice %169 {offsets = [16, 0], sizes = [8, 128], strides = [1, 1]} : vector<32x128xbf16> to vector<8x128xbf16>
    %c2_85 = arith.constant 2 : index
    %c0_86 = arith.constant 0 : index
    %c0_87 = arith.constant 0 : index
    %182 = vector.load %arg3[%c2_85, %c0_86, %c0_87] : memref<4x128x50xbf16, #tpu.memory_space<vmem>>, vector<1x128x50xbf16>
    %183 = vector.shape_cast %182 : vector<1x128x50xbf16> to vector<128x50xbf16>
    %cst_88 = arith.constant dense<0.000000e+00> : vector<8x50xf32>
    %184 = tpu.matmul %181, %183, %cst_88 {dimension_numbers = #tpu.dot_dimension_numbers<[1], [0], [0], [1], [0, 0, 1, 1], [], []>} : vector<8x128xbf16>, vector<128x50xbf16>, vector<8x50xf32> -> vector<8x50xf32>
    %185 = arith.addf %180, %184 : vector<8x50xf32>
    %186 = vector.extract_strided_slice %169 {offsets = [24, 0], sizes = [8, 128], strides = [1, 1]} : vector<32x128xbf16> to vector<8x128xbf16>
    %c3_89 = arith.constant 3 : index
    %c0_90 = arith.constant 0 : index
    %c0_91 = arith.constant 0 : index
    %187 = vector.load %arg3[%c3_89, %c0_90, %c0_91] : memref<4x128x50xbf16, #tpu.memory_space<vmem>>, vector<1x128x50xbf16>
    %188 = vector.shape_cast %187 : vector<1x128x50xbf16> to vector<128x50xbf16>
    %cst_92 = arith.constant dense<0.000000e+00> : vector<8x50xf32>
    %189 = tpu.matmul %186, %188, %cst_92 {dimension_numbers = #tpu.dot_dimension_numbers<[1], [0], [0], [1], [0, 0, 1, 1], [], []>} : vector<8x128xbf16>, vector<128x50xbf16>, vector<8x50xf32> -> vector<8x50xf32>
    %190 = arith.addf %185, %189 : vector<8x50xf32>
    %c0_93 = arith.constant 0 : index
    %c0_94 = arith.constant 0 : index
    %191 = vector.load %arg6[%c0_93, %c0_94] : memref<1x50xf32, #tpu.memory_space<vmem>>, vector<1x50xf32>
    %192 = vector.broadcast %191 : vector<1x50xf32> to vector<8x50xf32>
    %193 = arith.addf %190, %192 : vector<8x50xf32>
    %cst_95 = arith.constant 0.000000e+00 : f32
    %194 = vector.broadcast %cst_95 : f32 to vector<8x50xf32>
    %195 = arith.maximumf %193, %194 : vector<8x50xf32>
    %cst_96 = arith.constant dense<0.000000e+00> : vector<50xf32>
    %196 = vector.multi_reduction <add>, %195, %cst_96 [0] : vector<8x50xf32> to vector<50xf32>
    %197 = vector.shape_cast %196 : vector<50xf32> to vector<1x50xf32>
    %cst_97 = arith.constant 1.250000e-01 : f32
    %198 = vector.broadcast %cst_97 : f32 to vector<1x50xf32>
    %199 = arith.mulf %197, %198 : vector<1x50xf32>
    %200 = vector.broadcast %199 : vector<1x50xf32> to vector<8x50xf32>
    %201 = arith.subf %195, %200 : vector<8x50xf32>
    %202 = arith.mulf %201, %201 : vector<8x50xf32>
    %cst_98 = arith.constant dense<0.000000e+00> : vector<50xf32>
    %203 = vector.multi_reduction <add>, %202, %cst_98 [0] : vector<8x50xf32> to vector<50xf32>
    %204 = vector.shape_cast %203 : vector<50xf32> to vector<1x50xf32>
    %cst_99 = arith.constant 1.250000e-01 : f32
    %205 = vector.broadcast %cst_99 : f32 to vector<1x50xf32>
    %206 = arith.mulf %204, %205 : vector<1x50xf32>
    %c0_100 = arith.constant 0 : index
    %c0_101 = arith.constant 0 : index
    %207 = vector.load %arg11[%c0_100, %c0_101] : memref<1x50xf32, #tpu.memory_space<vmem>>, vector<1x50xf32>
    %cst_102 = arith.constant 9.99999974E-6 : f32
    %208 = vector.broadcast %cst_102 : f32 to vector<1x50xf32>
    %209 = arith.addf %206, %208 : vector<1x50xf32>
    %210 = math.rsqrt %209 : vector<1x50xf32>
    %211 = arith.mulf %207, %210 : vector<1x50xf32>
    %212 = vector.broadcast %211 : vector<1x50xf32> to vector<8x50xf32>
    %213 = arith.mulf %201, %212 : vector<8x50xf32>
    %c0_103 = arith.constant 0 : index
    %c0_104 = arith.constant 0 : index
    %214 = vector.load %arg12[%c0_103, %c0_104] : memref<1x50xf32, #tpu.memory_space<vmem>>, vector<1x50xf32>
    %215 = vector.broadcast %214 : vector<1x50xf32> to vector<8x50xf32>
    %216 = arith.addf %213, %215 : vector<8x50xf32>
    %c0_105 = arith.constant 0 : index
    %c0_106 = arith.constant 0 : index
    %217 = vector.load %arg15[%c0_105, %c0_106] : memref<8x50xf32, #tpu.memory_space<vmem>>, vector<8x50xf32>
    tpu.vector_store %arg15[%c0_105, %c0_106], %216 {strides = array<i32>} : memref<8x50xf32, #tpu.memory_space<vmem>>, vector<8x50xf32>,
    return
  }
}

</mosaic_0001>

<bundles_post_ra>
// kernel: _lambda_.1
= control target key start
LH: loop header
LB: loop body
LE: loop exit
PB: predicated region body
PF: predicated region fallthrough
CT: control target
= control target key end

     0   :  { %vm197_vm0 = vcmask 1045504   ;;  %v5342_v2 = vmov 0   ;;  %vm160_vm1 = vcmask 228352   ;;  %s5326_s0 = inlined_call_operand.vmem [shape: f32[224,28], index: 0, kind: input, shape index: {}]   ;;  %s5327_s1 = inlined_call_operand.vmem [shape: bf16[5,28,256], index: 1, kind: input, shape index: {}]   ;;  %s5328_s2 = inlined_call_operand.vmem [shape: bf16[5,128,256], index: 2, kind: input, shape index: {}]   ;;  %s5329_s3 = inlined_call_operand.vmem [shape: bf16[4,128,50], index: 3, kind: input, shape index: {}]   ;;  %s5330_s4 = inlined_call_operand.vmem [shape: f32[1,128], index: 4, kind: input, shape index: {}]   ;;  %s5331_s5 = inlined_call_operand.vmem [shape: f32[1,128], index: 5, kind: input, shape index: {}]   ;;  %s5332_s6 = inlined_call_operand.vmem [shape: f32[1,50], index: 6, kind: input, shape index: {}]   ;;  %s5333_s7 = inlined_call_operand.vmem [shape: f32[10,1], index: 7, kind: input, shape index: {}]   ;;  %s5334_s8 = inlined_call_operand.vmem [shape: f32[10,1], index: 8, kind: input, shape index: {}]   ;;  %s5335_s9 = inlined_call_operand.vmem [shape: f32[20,1], index: 9, kind: input, shape index: {}]   ;;  %s5336_s10 = inlined_call_operand.vmem [shape: f32[20,1], index: 10, kind: input, shape index: {}]   ;;  %s5337_s11 = inlined_call_operand.vmem [shape: f32[1,50], index: 11, kind: input, shape index: {}]   ;;  %s5338_s12 = inlined_call_operand.vmem [shape: f32[1,50], index: 12, kind: input, shape index: {}]   ;;  %s5339_s13 = inlined_call_operand.vmem [shape: f32[10,128], index: 13, kind: input, shape index: {}]   ;;  %s5340_s14 = inlined_call_operand.vmem [shape: f32[20,128], index: 14, kind: input, shape index: {}]   ;;  %s5341_s15 = inlined_call_operand.hbm [shape: f32[8,50], index: 15, kind: output, shape index: {}]  }
   0x1   :  { %v3797_v0 = vld [vmem:[%s5327_s1 + $0x4] ss:$8 sps:$4 sm:$0xff]   ;;  %v3799_v1 = vld [vmem:[%s5327_s1] ss:$8 sps:$4 sm:$0xff]   ;;  %449 = vmatprep.mubr.bf16.mxu0 %v5342_v2  ;;  %236 = vmatprep.mubr.bf16.mxu1 %v5342_v2  ;;  %v54_v13 = vld [vmem:[%s5326_s0 + $0x10] sm:$0xff] }
   0x2   :  { %417 = vmatprep.subr.bf16.mxu0 %v3797_v0  ;;  %v3800_v3 = vld [vmem:[%s5327_s1 + $0x14] ss:$8 sps:$4 sm:$0x3f]   ;;  %v3802_v4 = vld [vmem:[%s5327_s1 + $0x10] ss:$8 sps:$4 sm:$0x3f]   ;;  %3795 = vset.pattern.permute.xlu0 %v5342_v2 }
   0x3   :  { %418 = vmatpush1.bf16.msra.mxu0 %v3799_v1  ;;  %v52_v5 = vld [vmem:[%s5326_s0] sm:$0xff]  ;;  %v53_v6 = vld [vmem:[%s5326_s0 + $0x8] sm:$0xff]  ;;  %3796 = vset.pattern.permute.xlu1 %v5342_v2  ;;  %v412_v7 = vsel %vm197_vm0, %v3802_v4, 0  ;;  %v3806_v11 = vld [vmem:[%s5327_s1 + $0x54] ss:$8 sps:$4 sm:$0x3f]  }
   0x4   :  { %3115 = vmatprep.subr.msk.bf16.mxu0 %vm197_vm0, %v3800_v3  ;;  %v3805_v8 = vld [vmem:[%s5327_s1 + $0x44] ss:$8 sps:$4 sm:$0xff]   ;;  %v4126_v9 = vpack.c.bf16 %v53_v6, %v52_v5  ;;  %v3803_v10 = vld [vmem:[%s5327_s1 + $0x40] ss:$8 sps:$4 sm:$0xff]   ;;  %v55_v14 = vld [vmem:[%s5326_s0 + $0x18] sm:$0xff] }
   0x5   :  { %v3808_v12 = vld [vmem:[%s5327_s1 + $0x50] ss:$8 sps:$4 sm:$0x3f]   ;;  %v4148_v16 = vpack.c.bf16 %v55_v14, %v54_v13  ;;  %v3811_v17 = vld [vmem:[%s5327_s1 + $0x64] ss:$8 sps:$4 sm:$0xff]  }
   0x6   :  { %v597_v15 = vsel %vm197_vm0, %v3808_v12, 0  ;;  %v56_v18 = vld [vmem:[%s5326_s0 + $0x20] sm:$0xff]  ;;  %v57_v19 = vld [vmem:[%s5326_s0 + $0x28] sm:$0xff]  ;;  %v58_v21 = vld [vmem:[%s5326_s0 + $0x30] sm:$0xff] }
   0x7   :  { %420 = vmatpush1.bf16.msra.mxu0 %v412_v7  ;;  %v4162_v20 = vpack.c.bf16 %v57_v19, %v56_v18  ;;  %v59_v22 = vld [vmem:[%s5326_s0 + $0x38] sm:$0xff]  ;;  %v60_v24 = vld [vmem:[%s5326_s0 + $0x40] sm:$0xff]  ;;  %v61_v25 = vld [vmem:[%s5326_s0 + $0x48] sm:$0xff] }
   0x8   :  { %602 = vmatprep.subr.bf16.mxu0 %v3805_v8  ;;  %v4173_v23 = vpack.c.bf16 %v59_v22, %v58_v21  ;;  %v4184_v26 = vpack.c.bf16 %v61_v25, %v60_v24  ;;  %v62_v27 = vld [vmem:[%s5326_s0 + $0x50] sm:$0xff]  ;;  %v63_v28 = vld [vmem:[%s5326_s0 + $0x58] sm:$0xff]  ;;  %v64_v30 = vld [vmem:[%s5326_s0 + $0x60] sm:$0xff] }
   0x9   :  { %v4195_v29 = vpack.c.bf16 %v63_v28, %v62_v27  ;;  %v65_v31 = vld [vmem:[%s5326_s0 + $0x68] sm:$0xff]  ;;  %v66_v33 = vld [vmem:[%s5326_s0 + $0x70] sm:$0xff]  ;;  %v67_v34 = vld [vmem:[%s5326_s0 + $0x78] sm:$0xff] }
   0xa   :  { %3116 = vmatmul.mubr.msk.bf16.vlgmr.msra.gmra.mrb[0].mxu0 %vm160_vm1, %v4126_v9  ;;  %v4206_v32 = vpack.c.bf16 %v65_v31, %v64_v30  ;;  %v4217_v35 = vpack.c.bf16 %v67_v34, %v66_v33  ;;  %v68_v36 = vld [vmem:[%s5326_s0 + $0x80] sm:$0xff]  ;;  %v69_v37 = vld [vmem:[%s5326_s0 + $0x88] sm:$0xff] }
   0xb   :  { %603 = vmatpush1.bf16.msra.mxu0 %v3803_v10  ;;  %459 = vmatprep.mubr.bf16.mxu0 %v5342_v2 }
   0xc   :  { %3136 = vmatprep.subr.msk.bf16.mxu0 %vm197_vm0, %v3806_v11 }
   0xf   :  { %605 = vmatpush1.bf16.msra.mxu0 %v597_v15 }
  0x10   :  { %838 = vmatprep.subr.bf16.mxu0 %v3811_v17 }
  0x12   :  { %3117 = vmatmul.mubr.msk.bf16.gmra.mrb[4].mxu0 %vm160_vm1, %v4148_v16 }
  0x13   :  { %469 = vmatprep.mubr.bf16.mxu0 %v5342_v2 }
  0x1a   :  { %3118 = vmatmul.mubr.msk.bf16.gmra.mrb[8].mxu0 %vm160_vm1, %v4162_v20 }
  0x1b   :  { %479 = vmatprep.mubr.bf16.mxu0 %v5342_v2 }
  0x22   :  { %3119 = vmatmul.mubr.msk.bf16.gmra.mrb[12].mxu0 %vm160_vm1, %v4173_v23 }
  0x23   :  { %489 = vmatprep.mubr.bf16.mxu0 %v5342_v2 }
  0x2a   :  { %3120 = vmatmul.mubr.msk.bf16.gmra.mrb[16].mxu0 %vm160_vm1, %v4184_v26 }
  0x2b   :  { %499 = vmatprep.mubr.bf16.mxu0 %v5342_v2 }
  0x32   :  { %3121 = vmatmul.mubr.msk.bf16.gmra.mrb[20].mxu0 %vm160_vm1, %v4195_v29 }
  0x33   :  { %509 = vmatprep.mubr.bf16.mxu0 %v5342_v2 }
  0x3a   :  { %3122 = vmatmul.mubr.msk.bf16.gmra.mrb[24].mxu0 %vm160_vm1, %v4206_v32 }
  0x3b   :  { %519 = vmatprep.mubr.bf16.mxu0 %v5342_v2 }
  0x42   :  { %3123 = vmatmul.mubr.msk.bf16.gmra.mrb[28].mxu0 %vm160_vm1, %v4217_v35 }
  0x43   :  { %529 = vmatprep.mubr.bf16.mxu0 %v5342_v2 }
  0x44   :  { %20 = vsyncpa [#allocation3], 0  ;;  %v4228_v38 = vpack.c.bf16 %v69_v37, %v68_v36  ;;  %v70_v39 = vld [vmem:[%s5326_s0 + $0x90] sm:$0xff]  ;;  %v71_v40 = vld [vmem:[%s5326_s0 + $0x98] sm:$0xff]  ;;  %v118_v57 = vrot.slane %v4148_v16, 4  ;;  %v117_v58 = vrot.slane %v4126_v9, 4 }
  0x45   :  { %v4239_v41 = vpack.c.bf16 %v71_v40, %v70_v39  ;;  %v72_v42 = vld [vmem:[%s5326_s0 + $0xa0] sm:$0xff]  ;;  %v73_v43 = vld [vmem:[%s5326_s0 + $0xa8] sm:$0xff]  ;;  %v74_v45 = vld [vmem:[%s5326_s0 + $0xb0] sm:$0xff]  ;;  %vm116_vm2 = vcmask 1043456   ;;  %v120_v61 = vrot.slane %v4162_v20, 4  ;;  %v122_v63 = vrot.slane %v4173_v23, 4 }
  0x46   :  { %v4250_v44 = vpack.c.bf16 %v73_v43, %v72_v42  ;;  %v75_v46 = vld [vmem:[%s5326_s0 + $0xb8] sm:$0xff]  ;;  %v3809_v48 = vld [vmem:[%s5327_s1 + $0x60] ss:$8 sps:$4 sm:$0xff]   ;;  %v3817_v52 = vld [vmem:[%s5327_s1 + $0x84] ss:$8 sps:$4 sm:$0xff]   ;;  %v119_v60 = vsel %vm116_vm2, %v117_v58, %v118_v57  ;;  %v124_v1 = vrot.slane %v4184_v26, 4 }
  0x47   :  { %v4261_v47 = vpack.c.bf16 %v75_v46, %v74_v45  ;;  %v3812_v49 = vld [vmem:[%s5327_s1 + $0x74] ss:$8 sps:$4 sm:$0x3f]   ;;  %v3814_v50 = vld [vmem:[%s5327_s1 + $0x70] ss:$8 sps:$4 sm:$0x3f]   ;;  %v121_v62 = vsel %vm116_vm2, %v118_v57, %v120_v61  ;;  %v123_v0 = vsel %vm116_vm2, %v120_v61, %v122_v63 }
  0x48   :  { %v833_v51 = vsel %vm197_vm0, %v3814_v50, 0  ;;  %v3821_v53 = vld [vmem:[%s5327_s1 + $0x24] ss:$8 sps:$4 sm:$0xff]   ;;  %v3823_v54 = vld [vmem:[%s5327_s1 + $0x20] ss:$8 sps:$4 sm:$0xff]   ;;  %v125_v6 = vsel %vm116_vm2, %v122_v63, %v124_v1  ;;  %v126_v7 = vrot.slane %v4195_v29, 4 }
  0x49   :  { %204 = vmatprep.subr.bf16.mxu1 %v3821_v53  ;;  %v3824_v55 = vld [vmem:[%s5327_s1 + $0x34] ss:$8 sps:$4 sm:$0x3f]   ;;  %v3826_v56 = vld [vmem:[%s5327_s1 + $0x30] ss:$8 sps:$4 sm:$0x3f]  }
  0x4a   :  { %3124 = vmatmul.mubr.msk.bf16.gmra.mrb[32].mxu0 %vm160_vm1, %v4228_v38  ;;  %205 = vmatpush1.bf16.msra.mxu1 %v3823_v54  ;;  %v199_v59 = vsel %vm197_vm0, %v3826_v56, 0  ;;  %v76_v3 = vld [vmem:[%s5326_s0 + $0xc0] sm:$0xff]  ;;  %v77_v4 = vld [vmem:[%s5326_s0 + $0xc8] sm:$0xff]  ;;  %v127_v8 = vsel %vm116_vm2, %v124_v1, %v126_v7  ;;  %v3818_v10 = vld [vmem:[%s5327_s1 + $0x94] ss:$8 sps:$4 sm:$0x3f]  }
  0x4b   :  { %539 = vmatprep.mubr.bf16.mxu0 %v5342_v2  ;;  %3098 = vmatprep.subr.msk.bf16.mxu1 %vm197_vm0, %v3824_v55  ;;  %v4347_v5 = vpack.c.bf16 %v77_v4, %v76_v3  ;;  %v3815_v9 = vld [vmem:[%s5327_s1 + $0x80] ss:$8 sps:$4 sm:$0xff]   ;;  %v3820_v11 = vld [vmem:[%s5327_s1 + $0x90] ss:$8 sps:$4 sm:$0x3f]   ;;  %v128_v12 = vrot.slane %v4206_v32, 4 }
  0x4c   :  { %v1066_v13 = vsel %vm197_vm0, %v3820_v11, 0  ;;  %v130_v15 = vrot.slane %v4217_v35, 4  ;;  %v132_v17 = vrot.slane %v4228_v38, 4  ;;  %v134_v19 = vrot.slane %v4239_v41, 4  ;;  %v78_v31 = vld [vmem:[%s5326_s0 + $0xd0] sm:$0xff]  ;;  %v79_v33 = vld [vmem:[%s5326_s0 + $0xd8] sm:$0xff] }
  0x4d   :  { %v129_v14 = vsel %vm116_vm2, %v126_v7, %v128_v12  ;;  %v136_v22 = vrot.slane %v4250_v44, 4  ;;  %v138_v25 = vrot.slane %v4261_v47, 4  ;;  %v140_v28 = vrot.slane %v4347_v5, 4 }
  0x4e   :  { %207 = vmatpush1.bf16.msra.mxu1 %v199_v59  ;;  %v133_v18 = vsel %vm116_vm2, %v130_v15, %v132_v17  ;;  %v135_v21 = vsel %vm116_vm2, %v132_v17, %v134_v19  ;;  %v93_v34 = vpack.c.bf16 %v79_v33, %v78_v31  ;;  %vm1362_vm3 = vcmask 1041408  }
  0x4f   :  { %v137_v24 = vsel %vm116_vm2, %v134_v19, %v136_v22  ;;  %v139_v27 = vsel %vm116_vm2, %v136_v22, %v138_v25  ;;  %v141_v30 = vsel %vm116_vm2, %v138_v25, %v140_v28  ;;  %vm4017_vm4 = vmmov 0  }
  0x50   :  { %v809_v36 = vrot.slane %v93_v34, 4  ;;  %vm3037_vm5 = vcmask 408576  }
  0x51   :  { %3099 = vmatmul.mubr.msk.bf16.vlgmr.msra.gmra.mrb[0].mxu1 %vm160_vm1, %v119_v60 }
  0x52   :  { %3125 = vmatmul.mubr.msk.bf16.gmra.mrb[36].mxu0 %vm160_vm1, %v4239_v41  ;;  %246 = vmatprep.mubr.bf16.mxu1 %v5342_v2  ;;  %v810_v37 = vsel %vm116_vm2, %v140_v28, %v809_v36 }
  0x53   :  { %549 = vmatprep.mubr.bf16.mxu0 %v5342_v2 }
  0x59   :  { %3100 = vmatmul.mubr.msk.bf16.gmra.mrb[4].mxu1 %vm160_vm1, %v121_v62 }
  0x5a   :  { %3126 = vmatmul.mubr.msk.bf16.gmra.mrb[40].mxu0 %vm160_vm1, %v4250_v44  ;;  %256 = vmatprep.mubr.bf16.mxu1 %v5342_v2 }
  0x5b   :  { %559 = vmatprep.mubr.bf16.mxu0 %v5342_v2 }
  0x61   :  { %3101 = vmatmul.mubr.msk.bf16.gmra.mrb[8].mxu1 %vm160_vm1, %v123_v0 }
  0x62   :  { %3127 = vmatmul.mubr.msk.bf16.gmra.mrb[44].mxu0 %vm160_vm1, %v4261_v47  ;;  %266 = vmatprep.mubr.bf16.mxu1 %v5342_v2 }
  0x63   :  { %634 = vmatprep.mubr.bf16.mxu0 %v5342_v2 }
  0x69   :  { %3102 = vmatmul.mubr.msk.bf16.gmra.mrb[12].mxu1 %vm160_vm1, %v125_v6 }
  0x6a   :  { %3137 = vmatmul.mubr.msk.bf16.vlgmr.msra.gmra.mrb[0].mxu0 %vm160_vm1, %v4148_v16  ;;  %276 = vmatprep.mubr.bf16.mxu1 %v5342_v2  ;;  %v131_v16 = vsel %vm116_vm2, %v128_v12, %v130_v15 }
  0x6b   :  { %839 = vmatpush1.bf16.msra.mxu0 %v3809_v48  ;;  %644 = vmatprep.mubr.bf16.mxu0 %v5342_v2 }
  0x6c   :  { %3157 = vmatprep.subr.msk.bf16.mxu0 %vm197_vm0, %v3812_v49 }
  0x6f   :  { %841 = vmatpush1.bf16.msra.mxu0 %v833_v51 }
  0x70   :  { %1071 = vmatprep.subr.bf16.mxu0 %v3817_v52 }
  0x71   :  { %3103 = vmatmul.mubr.msk.bf16.gmra.mrb[16].mxu1 %vm160_vm1, %v127_v8 }
  0x72   :  { %3138 = vmatmul.mubr.msk.bf16.gmra.mrb[4].mxu0 %vm160_vm1, %v4162_v20  ;;  %286 = vmatprep.mubr.bf16.mxu1 %v5342_v2 }
  0x73   :  { %654 = vmatprep.mubr.bf16.mxu0 %v5342_v2 }
  0x79   :  { %3104 = vmatmul.mubr.msk.bf16.gmra.mrb[20].mxu1 %vm160_vm1, %v129_v14 }
  0x7a   :  { %3139 = vmatmul.mubr.msk.bf16.gmra.mrb[8].mxu0 %vm160_vm1, %v4173_v23  ;;  %296 = vmatprep.mubr.bf16.mxu1 %v5342_v2 }
  0x7b   :  { %664 = vmatprep.mubr.bf16.mxu0 %v5342_v2 }
  0x81   :  { %3105 = vmatmul.mubr.msk.bf16.gmra.mrb[24].mxu1 %vm160_vm1, %v131_v16 }
  0x82   :  { %3140 = vmatmul.mubr.msk.bf16.gmra.mrb[12].mxu0 %vm160_vm1, %v4184_v26  ;;  %306 = vmatprep.mubr.bf16.mxu1 %v5342_v2 }
  0x83   :  { %674 = vmatprep.mubr.bf16.mxu0 %v5342_v2 }
  0x89   :  { %3106 = vmatmul.mubr.msk.bf16.gmra.mrb[28].mxu1 %vm160_vm1, %v133_v18 }
  0x8a   :  { %3141 = vmatmul.mubr.msk.bf16.gmra.mrb[16].mxu0 %vm160_vm1, %v4195_v29  ;;  %316 = vmatprep.mubr.bf16.mxu1 %v5342_v2 }
  0x8b   :  { %684 = vmatprep.mubr.bf16.mxu0 %v5342_v2 }
  0x91   :  { %3107 = vmatmul.mubr.msk.bf16.gmra.mrb[32].mxu1 %vm160_vm1, %v135_v21 }
  0x92   :  { %3142 = vmatmul.mubr.msk.bf16.gmra.mrb[20].mxu0 %vm160_vm1, %v4206_v32  ;;  %326 = vmatprep.mubr.bf16.mxu1 %v5342_v2 }
  0x93   :  { %694 = vmatprep.mubr.bf16.mxu0 %v5342_v2 }
  0x99   :  { %3108 = vmatmul.mubr.msk.bf16.gmra.mrb[36].mxu1 %vm160_vm1, %v137_v24 }
  0x9a   :  { %3143 = vmatmul.mubr.msk.bf16.gmra.mrb[24].mxu0 %vm160_vm1, %v4217_v35  ;;  %336 = vmatprep.mubr.bf16.mxu1 %v5342_v2 }
  0x9b   :  { %704 = vmatprep.mubr.bf16.mxu0 %v5342_v2 }
  0xa1   :  { %3109 = vmatmul.mubr.msk.bf16.gmra.mrb[40].mxu1 %vm160_vm1, %v139_v27 }
  0xa2   :  { %3144 = vmatmul.mubr.msk.bf16.gmra.mrb[28].mxu0 %vm160_vm1, %v4228_v38  ;;  %346 = vmatprep.mubr.bf16.mxu1 %v5342_v2 }
  0xa3   :  { %714 = vmatprep.mubr.bf16.mxu0 %v5342_v2 }
  0xa9   :  { %3110 = vmatmul.mubr.msk.bf16.gmra.mrb[44].mxu1 %vm160_vm1, %v141_v30 }
  0xaa   :  { %3145 = vmatmul.mubr.msk.bf16.gmra.mrb[32].mxu0 %vm160_vm1, %v4239_v41  ;;  %1671 = vmatprep.mubr.bf16.mxu1 %v5342_v2 }
  0xab   :  { %724 = vmatprep.mubr.bf16.mxu0 %v5342_v2 }
  0xb2   :  { %3146 = vmatmul.mubr.msk.bf16.gmra.mrb[36].mxu0 %vm160_vm1, %v4250_v44 }
  0xb3   :  { %734 = vmatprep.mubr.bf16.mxu0 %v5342_v2 }
  0xba   :  { %3147 = vmatmul.mubr.msk.bf16.gmra.mrb[40].mxu0 %vm160_vm1, %v4261_v47 }
  0xbb   :  { %744 = vmatprep.mubr.bf16.mxu0 %v5342_v2 }
  0xc2   :  { %3148 = vmatmul.mubr.msk.bf16.gmra.mrb[44].mxu0 %vm160_vm1, %v4347_v5 }
  0xc3   :  { %870 = vmatprep.mubr.bf16.mxu0 %v5342_v2 }
  0xca   :  { %3158 = vmatmul.mubr.msk.bf16.vlgmr.msra.gmra.mrb[0].mxu0 %vm160_vm1, %v121_v62 }
  0xcb   :  { %1072 = vmatpush1.bf16.msra.mxu0 %v3815_v9  ;;  %880 = vmatprep.mubr.bf16.mxu0 %v5342_v2 }
  0xcc   :  { %3178 = vmatprep.subr.msk.bf16.mxu0 %vm197_vm0, %v3818_v10 }
  0xcf   :  { %1074 = vmatpush1.bf16.msra.mxu0 %v1066_v13 }
  0xd2   :  { %3159 = vmatmul.mubr.msk.bf16.gmra.mrb[4].mxu0 %vm160_vm1, %v123_v0 }
  0xd3   :  { %890 = vmatprep.mubr.bf16.mxu0 %v5342_v2 }
  0xda   :  { %3160 = vmatmul.mubr.msk.bf16.gmra.mrb[8].mxu0 %vm160_vm1, %v125_v6 }
  0xdb   :  { %900 = vmatprep.mubr.bf16.mxu0 %v5342_v2 }
  0xe2   :  { %3161 = vmatmul.mubr.msk.bf16.gmra.mrb[12].mxu0 %vm160_vm1, %v127_v8 }
  0xe3   :  { %910 = vmatprep.mubr.bf16.mxu0 %v5342_v2 }
  0xea   :  { %3162 = vmatmul.mubr.msk.bf16.gmra.mrb[16].mxu0 %vm160_vm1, %v129_v14 }
  0xeb   :  { %920 = vmatprep.mubr.bf16.mxu0 %v5342_v2 }
  0xf2   :  { %3163 = vmatmul.mubr.msk.bf16.gmra.mrb[20].mxu0 %vm160_vm1, %v131_v16 }
  0xf3   :  { %930 = vmatprep.mubr.bf16.mxu0 %v5342_v2 }
  0xfa   :  { %3164 = vmatmul.mubr.msk.bf16.gmra.mrb[24].mxu0 %vm160_vm1, %v133_v18 }
  0xfb   :  { %940 = vmatprep.mubr.bf16.mxu0 %v5342_v2 }
 0x102   :  { %3165 = vmatmul.mubr.msk.bf16.gmra.mrb[28].mxu0 %vm160_vm1, %v135_v21 }
 0x103   :  { %950 = vmatprep.mubr.bf16.mxu0 %v5342_v2 }
 0x10a   :  { %3166 = vmatmul.mubr.msk.bf16.gmra.mrb[32].mxu0 %vm160_vm1, %v137_v24 }
 0x10b   :  { %960 = vmatprep.mubr.bf16.mxu0 %v5342_v2 }
 0x112   :  { %3167 = vmatmul.mubr.msk.bf16.gmra.mrb[36].mxu0 %vm160_vm1, %v139_v27 }
 0x113   :  { %970 = vmatprep.mubr.bf16.mxu0 %v5342_v2 }
 0x11a   :  { %3168 = vmatmul.mubr.msk.bf16.gmra.mrb[40].mxu0 %vm160_vm1, %v141_v30 }
 0x11b   :  { %980 = vmatprep.mubr.bf16.mxu0 %v5342_v2 }
 0x122   :  { %3169 = vmatmul.mubr.msk.bf16.gmra.mrb[44].mxu0 %vm160_vm1, %v810_v37 }
 0x123   :  { %1103 = vmatprep.mubr.bf16.mxu0 %v5342_v2 }
 0x12a   :  { %3179 = vmatmul.mubr.msk.bf16.vlgmr.msra.gmra.mrb[0].mxu0 %vm160_vm1, %v4162_v20  ;;  %v238_v20 = vpop.f32.mrb[0].mxu1 }
 0x12b   :  { %1113 = vmatprep.mubr.bf16.mxu0 %v5342_v2 }
 0x132   :  { %3180 = vmatmul.mubr.msk.bf16.gmra.mrb[4].mxu0 %vm160_vm1, %v4173_v23  ;;  %v240_v23 = vpop.f32.mrb[1].mxu1 }
 0x133   :  { %1123 = vmatprep.mubr.bf16.mxu0 %v5342_v2 }
 0x13a   :  { %3181 = vmatmul.mubr.msk.bf16.gmra.mrb[8].mxu0 %vm160_vm1, %v4184_v26  ;;  %v242_v26 = vpop.f32.mrb[2].mxu1 }
 0x13b   :  { %1133 = vmatprep.mubr.bf16.mxu0 %v5342_v2 }
 0x142   :  { %3182 = vmatmul.mubr.msk.bf16.gmra.mrb[12].mxu0 %vm160_vm1, %v4195_v29  ;;  %v244_v29 = vpop.f32.mrb[3].mxu1 }
 0x143   :  { %1143 = vmatprep.mubr.bf16.mxu0 %v5342_v2 }
 0x14a   :  { %3183 = vmatmul.mubr.msk.bf16.gmra.mrb[16].mxu0 %vm160_vm1, %v4206_v32  ;;  %v248_v32 = vpop.f32.mrb[4].mxu1 }
 0x14b   :  { %1153 = vmatprep.mubr.bf16.mxu0 %v5342_v2 }
 0x152   :  { %3184 = vmatmul.mubr.msk.bf16.gmra.mrb[20].mxu0 %vm160_vm1, %v4217_v35  ;;  %v250_v35 = vpop.f32.mrb[5].mxu1 }
 0x153   :  { %1163 = vmatprep.mubr.bf16.mxu0 %v5342_v2 }
 0x15a   :  { %3185 = vmatmul.mubr.msk.bf16.gmra.mrb[24].mxu0 %vm160_vm1, %v4228_v38  ;;  %v252_v38 = vpop.f32.mrb[6].mxu1 }
 0x15b   :  { %1173 = vmatprep.mubr.bf16.mxu0 %v5342_v2  ;;  %v254_v39 = vpop.f32.mrb[7].mxu1 }
 0x15c   :  { %v4463_v40 = vpop.f32.mrb[8].mxu1 }
 0x162   :  { %3186 = vmatmul.mubr.msk.bf16.gmra.mrb[28].mxu0 %vm160_vm1, %v4239_v41  ;;  %v4465_v41 = vpop.f32.mrb[9].mxu1 }
 0x163   :  { %1183 = vmatprep.mubr.bf16.mxu0 %v5342_v2  ;;  %v4467_v42 = vpop.f32.mrb[10].mxu1 }
 0x164   :  { %v4469_v43 = vpop.f32.mrb[11].mxu1 }
 0x16a   :  { %3187 = vmatmul.mubr.msk.bf16.gmra.mrb[32].mxu0 %vm160_vm1, %v4250_v44  ;;  %v4471_v44 = vpop.f32.mrb[12].mxu1 }
 0x16b   :  { %1193 = vmatprep.mubr.bf16.mxu0 %v5342_v2  ;;  %v4473_v45 = vpop.f32.mrb[13].mxu1 }
 0x16c   :  { %v4475_v46 = vpop.f32.mrb[14].mxu1 }
 0x172   :  { %3188 = vmatmul.mubr.msk.bf16.gmra.mrb[36].mxu0 %vm160_vm1, %v4261_v47  ;;  %v4477_v47 = vpop.f32.mrb[15].mxu1 }
 0x173   :  { %1203 = vmatprep.mubr.bf16.mxu0 %v5342_v2  ;;  %v4479_v48 = vpop.f32.mrb[16].mxu1 }
 0x174   :  { %v4481_v49 = vpop.f32.mrb[17].mxu1 }
 0x175   :  { %v4483_v50 = vpop.f32.mrb[18].mxu1 }
 0x176   :  { %v4485_v51 = vpop.f32.mrb[19].mxu1 }
 0x177   :  { %v4487_v52 = vpop.f32.mrb[20].mxu1 }
 0x178   :  { %v4489_v53 = vpop.f32.mrb[21].mxu1 }
 0x179   :  { %v4491_v54 = vpop.f32.mrb[22].mxu1 }
 0x17a   :  { %3189 = vmatmul.mubr.msk.bf16.gmra.mrb[40].mxu0 %vm160_vm1, %v4347_v5  ;;  %v4493_v55 = vpop.f32.mrb[23].mxu1 }
 0x17b   :  { %1213 = vmatprep.mubr.bf16.mxu0 %v5342_v2  ;;  %v4495_v56 = vpop.f32.mrb[24].mxu1 }
 0x17c   :  { %v4497_v57 = vpop.f32.mrb[25].mxu1 }
 0x17d   :  { %v4499_v58 = vpop.f32.mrb[26].mxu1 }
 0x17e   :  { %v4501_v59 = vpop.f32.mrb[27].mxu1 }
 0x17f   :  { %v4503_v60 = vpop.f32.mrb[28].mxu1 }
 0x180   :  { %v4505_v61 = vpop.f32.mrb[29].mxu1 }
 0x181   :  { %v4507_v62 = vpop.f32.mrb[30].mxu1 }
 0x182   :  { %3190 = vmatmul.mubr.msk.bf16.gmra.mrb[44].mxu0 %vm160_vm1, %v93_v34  ;;  %v4509_v63 = vpop.f32.mrb[31].mxu1 }
 0x183   :  { %v4511_v0 = vpop.f32.mrb[32].mxu1 }
 0x184   :  { %v4513_v1 = vpop.f32.mrb[33].mxu1 }
 0x185   :  { %v4515_v3 = vpop.f32.mrb[34].mxu1 }
 0x186   :  { %v4517_v4 = vpop.f32.mrb[35].mxu1 }
 0x187   :  { %v4519_v5 = vpop.f32.mrb[36].mxu1 }
 0x188   :  { %v4521_v6 = vpop.f32.mrb[37].mxu1 }
 0x189   :  { %v4523_v7 = vpop.f32.mrb[38].mxu1 }
 0x18a   :  { %v4525_v8 = vpop.f32.mrb[39].mxu1 }
 0x18b   :  { %v4527_v9 = vpop.f32.mrb[40].mxu1 }
 0x18c   :  { %v4529_v10 = vpop.f32.mrb[41].mxu1 }
 0x18d   :  { %v4531_v11 = vpop.f32.mrb[42].mxu1 }
 0x18e   :  { %v4533_v12 = vpop.f32.mrb[43].mxu1 }
 0x18f   :  { %v4535_v13 = vpop.f32.mrb[44].mxu1 }
 0x190   :  { %5344 = vst [vmem:[#allocation5_spill] sm:$0xff] %v4535_v13  ;;  %v4537_v14 = vpop.f32.mrb[45].mxu1 }
 0x191   :  { %5345 = vst [vmem:[#allocation6_spill] sm:$0xff] %v4537_v14  ;;  %v4539_v15 = vpop.f32.mrb[46].mxu1 }
 0x192   :  { %5346 = vst [vmem:[#allocation7_spill] sm:$0xff] %v4539_v15  ;;  %v4541_v16 = vpop.f32.mrb[47].mxu1 }
 0x193   :  { %5347 = vst [vmem:[#allocation8_spill] sm:$0xff] %v4541_v16 }
 0x1fd   :  { %v1105_v17 = vpop.f32.mrb[0].mxu0 }
 0x1fe   :  { %v3535_v18 = vadd.f32 %v1105_v17, %v238_v20  ;;  %v1107_v19 = vpop.f32.mrb[1].mxu0 }
 0x1ff   :  { %v3536_v21 = vadd.f32 %v1107_v19, %v240_v23  ;;  %v1109_v22 = vpop.f32.mrb[2].mxu0 }
 0x200   :  { %v3537_v24 = vadd.f32 %v1109_v22, %v242_v26  ;;  %v1111_v25 = vpop.f32.mrb[3].mxu0 }
 0x201   :  { %v3538_v27 = vadd.f32 %v1111_v25, %v244_v29 }
 0x202   :  { %v1272_v28 = vmax.f32 %v3535_v18, %v3537_v24 }
 0x203   :  { %v1273_v30 = vmax.f32 %v3536_v21, %v3538_v27 }
 0x205   :  { %v4543_v31 = vmax.f32 %v1272_v28, %v1273_v30  ;;  %v1115_v33 = vpop.f32.mrb[4].mxu0 }
 0x206   :  { %v3539_v34 = vadd.f32 %v1115_v33, %v248_v32  ;;  %v1117_v36 = vpop.f32.mrb[5].mxu0 }
 0x207   :  { %v3540_v37 = vadd.f32 %v1117_v36, %v250_v35  ;;  %v1119_v2 = vpop.f32.mrb[6].mxu0 }
 0x208   :  { %v3541_v15 = vadd.f32 %v1119_v2, %v252_v38  ;;  %v1121_v14 = vpop.f32.mrb[7].mxu0 }
 0x209   :  { %v3542_v16 = vadd.f32 %v1121_v14, %v254_v39 }
 0x20a   :  { %v1274_v13 = vmax.f32 %v3539_v34, %v3541_v15 }
 0x20b   :  { %v1275_v20 = vmax.f32 %v3540_v37, %v3542_v16 }
 0x20d   :  { %v4545_v17 = vmax.f32 %v1274_v13, %v1275_v20  ;;  %v1125_v23 = vpop.f32.mrb[8].mxu0 }
 0x20e   :  { %v3543_v26 = vadd.f32 %v1125_v23, %v4463_v40  ;;  %v1127_v29 = vpop.f32.mrb[9].mxu0 }
 0x20f   :  { %v3544_v18 = vadd.f32 %v1127_v29, %v4465_v41  ;;  %v1129_v19 = vpop.f32.mrb[10].mxu0 }
 0x210   :  { %v3545_v21 = vadd.f32 %v1129_v19, %v4467_v42  ;;  %v1131_v32 = vpop.f32.mrb[11].mxu0 }
 0x211   :  { %v3546_v35 = vadd.f32 %v1131_v32, %v4469_v43 }
 0x212   :  { %v1276_v22 = vmax.f32 %v3543_v26, %v3545_v21 }
 0x213   :  { %v1277_v2 = vmax.f32 %v3544_v18, %v3546_v35 }
 0x215   :  { %v4551_v38 = vmax.f32 %v1276_v22, %v1277_v2  ;;  %v1135_v39 = vpop.f32.mrb[12].mxu0 }
 0x216   :  { %v3547_v13 = vadd.f32 %v1135_v39, %v4471_v44  ;;  %v1137_v14 = vpop.f32.mrb[13].mxu0 }
 0x217   :  { %v3548_v15 = vadd.f32 %v1137_v14, %v4473_v45  ;;  %v1139_v40 = vpop.f32.mrb[14].mxu0 }
 0x218   :  { %v3549_v16 = vadd.f32 %v1139_v40, %v4475_v46  ;;  %v1141_v41 = vpop.f32.mrb[15].mxu0 }
 0x219   :  { %v3550_v24 = vadd.f32 %v1141_v41, %v4477_v47 }
 0x21a   :  { %v1278_v42 = vmax.f32 %v3547_v13, %v3549_v16 }
 0x21b   :  { %v1279_v25 = vmax.f32 %v3548_v15, %v3550_v24 }
 0x21d   :  { %v4557_v27 = vmax.f32 %v1278_v42, %v1279_v25  ;;  %v1145_v43 = vpop.f32.mrb[16].mxu0 }
 0x21e   :  { %v3551_v28 = vadd.f32 %v1145_v43, %v4479_v48  ;;  %v1147_v30 = vpop.f32.mrb[17].mxu0 }
 0x21f   :  { %v3552_v33 = vadd.f32 %v1147_v30, %v4481_v49  ;;  %v1149_v44 = vpop.f32.mrb[18].mxu0 }
 0x220   :  { %v3553_v34 = vadd.f32 %v1149_v44, %v4483_v50  ;;  %v1151_v45 = vpop.f32.mrb[19].mxu0 }
 0x221   :  { %v3554_v36 = vadd.f32 %v1151_v45, %v4485_v51 }
 0x222   :  { %v1280_v46 = vmax.f32 %v3551_v28, %v3553_v34 }
 0x223   :  { %v1281_v37 = vmax.f32 %v3552_v33, %v3554_v36 }
 0x225   :  { %v4563_v20 = vmax.f32 %v1280_v46, %v1281_v37  ;;  %v1155_v47 = vpop.f32.mrb[20].mxu0 }
 0x226   :  { %v3555_v23 = vadd.f32 %v1155_v47, %v4487_v52  ;;  %v1157_v26 = vpop.f32.mrb[21].mxu0 }
 0x227   :  { %v3556_v29 = vadd.f32 %v1157_v26, %v4489_v53  ;;  %v1159_v48 = vpop.f32.mrb[22].mxu0 }
 0x228   :  { %v3557_v18 = vadd.f32 %v1159_v48, %v4491_v54  ;;  %v1161_v49 = vpop.f32.mrb[23].mxu0 }
 0x229   :  { %v3558_v19 = vadd.f32 %v1161_v49, %v4493_v55 }
 0x22a   :  { %v1282_v50 = vmax.f32 %v3555_v23, %v3557_v18 }
 0x22b   :  { %v1283_v21 = vmax.f32 %v3556_v29, %v3558_v19 }
 0x22d   :  { %v1301_v32 = vmax.f32 %v1282_v50, %v1283_v21  ;;  %v1165_v51 = vpop.f32.mrb[24].mxu0 }
 0x22e   :  { %v3559_v35 = vadd.f32 %v1165_v51, %v4495_v56  ;;  %v1167_v22 = vpop.f32.mrb[25].mxu0 }
 0x22f   :  { %v3560_v2 = vadd.f32 %v1167_v22, %v4497_v57  ;;  %v1169_v39 = vpop.f32.mrb[26].mxu0 }
 0x230   :  { %v3561_v52 = vadd.f32 %v1169_v39, %v4499_v58  ;;  %v1171_v13 = vpop.f32.mrb[27].mxu0 }
 0x231   :  { %v3562_v53 = vadd.f32 %v1171_v13, %v4501_v59 }
 0x232   :  { %v1284_v14 = vmax.f32 %v3559_v35, %v3561_v52 }
 0x233   :  { %v1285_v54 = vmax.f32 %v3560_v2, %v3562_v53 }
 0x235   :  { %v1302_v15 = vmax.f32 %v1284_v14, %v1285_v54  ;;  %v1175_v40 = vpop.f32.mrb[28].mxu0 }
 0x236   :  { %v3563_v55 = vadd.f32 %v1175_v40, %v4503_v60  ;;  %v1177_v16 = vpop.f32.mrb[29].mxu0 }
 0x237   :  { %v3564_v41 = vadd.f32 %v1177_v16, %v4505_v61  ;;  %v1179_v24 = vpop.f32.mrb[30].mxu0  ;;  %v5348_v16 = vld [vmem:[#allocation5_spill] sm:$0xff] }
 0x238   :  { %v3565_v56 = vadd.f32 %v1179_v24, %v4507_v62  ;;  %v1181_v42 = vpop.f32.mrb[31].mxu0 }
 0x239   :  { %v3566_v57 = vadd.f32 %v1181_v42, %v4509_v63  ;;  %v4584_v63 = vld [vmem:[%s5330_s4] ss:$0 sm:$0xff] }
 0x23a   :  { %v1286_v25 = vmax.f32 %v3563_v55, %v3565_v56  ;;  %v4595_v26 = vadd.f32 %v4584_v63, %v4543_v31  ;;  %v4599_v29 = vadd.f32 %v4584_v63, %v4551_v38  ;;  %v4611_v31 = vadd.f32 %v4584_v63, %v4563_v20 }
 0x23b   :  { %v1287_v58 = vmax.f32 %v3564_v41, %v3566_v57  ;;  %v4620_v51 = vadd.f32 %v4584_v63, %v1301_v32  ;;  %v4628_v52 = vadd.f32 %v4584_v63, %v1302_v15 }
 0x23c   :  { %v1329_v49 = vmax.f32 %v4599_v29, 0.0  ;;  %v1331_v39 = vmax.f32 %v4611_v31, 0.0 }
 0x23d   :  { %v1303_v43 = vmax.f32 %v1286_v25, %v1287_v58  ;;  %v1185_v28 = vpop.f32.mrb[32].mxu0  ;;  %v1333_v40 = vmax.f32 %v4628_v52, 0.0  ;;  %v5349_v25 = vld [vmem:[#allocation6_spill] sm:$0xff] }
 0x23e   :  { %v3567_v59 = vadd.f32 %v1185_v28, %v4511_v0  ;;  %v1187_v30 = vpop.f32.mrb[33].mxu0  ;;  %v5350_v28 = vld [vmem:[#allocation7_spill] sm:$0xff] }
 0x23f   :  { %v3568_v33 = vadd.f32 %v1187_v30, %v4513_v1  ;;  %v1189_v44 = vpop.f32.mrb[34].mxu0  ;;  %v4589_v1 = vadd.f32 %v4584_v63, %v4545_v17  ;;  %v4635_v14 = vadd.f32 %v4584_v63, %v1303_v43 }
 0x240   :  { %v3569_v60 = vadd.f32 %v1189_v44, %v4515_v3  ;;  %v1191_v34 = vpop.f32.mrb[35].mxu0 }
 0x241   :  { %v3570_v61 = vadd.f32 %v1191_v34, %v4517_v4  ;;  %v1328_v17 = vmax.f32 %v4589_v1, 0.0  ;;  %v1334_v42 = vmax.f32 %v4635_v14, 0.0  ;;  %v5351_v34 = vld [vmem:[#allocation8_spill] sm:$0xff] }
 0x242   :  { %v1288_v45 = vmax.f32 %v3567_v59, %v3569_v60 }
 0x243   :  { %v1289_v62 = vmax.f32 %v3568_v33, %v3570_v61 }
 0x245   :  { %v1304_v36 = vmax.f32 %v1288_v45, %v1289_v62  ;;  %v1195_v46 = vpop.f32.mrb[36].mxu0 }
 0x246   :  { %v3571_v0 = vadd.f32 %v1195_v46, %v4519_v5  ;;  %v1197_v37 = vpop.f32.mrb[37].mxu0 }
 0x247   :  { %v3572_v3 = vadd.f32 %v1197_v37, %v4521_v6  ;;  %v1199_v47 = vpop.f32.mrb[38].mxu0  ;;  %v4605_v6 = vadd.f32 %v4584_v63, %v4557_v27  ;;  %v4641_v15 = vadd.f32 %v4584_v63, %v1304_v36 }
 0x248   :  { %v3573_v4 = vadd.f32 %v1199_v47, %v4523_v7  ;;  %v1201_v23 = vpop.f32.mrb[39].mxu0  ;;  %v1327_v7 = vmax.f32 %v4595_v26, 0.0 }
 0x249   :  { %v3574_v5 = vadd.f32 %v1201_v23, %v4525_v8  ;;  %v1330_v21 = vmax.f32 %v4605_v6, 0.0  ;;  %v1335_v44 = vmax.f32 %v4641_v15, 0.0 }
 0x24a   :  { %v1290_v48 = vmax.f32 %v3571_v0, %v3573_v4  ;;  %v1341_v27 = vadd.f32 %v1328_v17, %v1327_v7 }
 0x24b   :  { %v1291_v18 = vmax.f32 %v3572_v3, %v3574_v5 }
 0x24d   :  { %v1305_v38 = vmax.f32 %v1290_v48, %v1291_v18  ;;  %v1205_v19 = vpop.f32.mrb[40].mxu0 }
 0x24e   :  { %v3575_v8 = vadd.f32 %v1205_v19, %v4527_v9  ;;  %v1207_v50 = vpop.f32.mrb[41].mxu0  ;;  %v1342_v9 = vadd.f32 %v1341_v27, %v1329_v49  ;;  %v4667_v27 = vld [vmem:[%s5339_s13 + $0x8] sm:$0x3] }
 0x24f   :  { %v3576_v35 = vadd.f32 %v1207_v50, %v4529_v10  ;;  %v1209_v22 = vpop.f32.mrb[42].mxu0  ;;  %v1332_v10 = vmax.f32 %v4620_v51, 0.0  ;;  %v4648_v57 = vadd.f32 %v4584_v63, %v1305_v38 }
 0x250   :  { %v3577_v20 = vadd.f32 %v1209_v22, %v4531_v11  ;;  %v1211_v2 = vpop.f32.mrb[43].mxu0  ;;  %v1343_v32 = vadd.f32 %v1342_v9, %v1330_v21 }
 0x251   :  { %v3578_v13 = vadd.f32 %v1211_v2, %v4533_v12  ;;  %v1336_v36 = vmax.f32 %v4648_v57, 0.0 }
 0x252   :  { %v1292_v53 = vmax.f32 %v3575_v8, %v3577_v20  ;;  %v1344_v54 = vadd.f32 %v1343_v32, %v1331_v39 }
 0x253   :  { %v1293_v11 = vmax.f32 %v3576_v35, %v3578_v13 }
 0x254   :  { %v1345_v56 = vadd.f32 %v1344_v54, %v1332_v10 }
 0x255   :  { %v1306_v55 = vmax.f32 %v1292_v53, %v1293_v11  ;;  %v1215_v12 = vpop.f32.mrb[44].mxu0 }
 0x256   :  { %v3579_v41 = vadd.f32 %v1215_v12, %v5348_v16  ;;  %v1217_v24 = vpop.f32.mrb[45].mxu0  ;;  %v1346_v33 = vadd.f32 %v1345_v56, %v1333_v40 }
 0x257   :  { %v3580_v58 = vadd.f32 %v1217_v24, %v5349_v25  ;;  %v1219_v43 = vpop.f32.mrb[46].mxu0  ;;  %v4656_v60 = vadd.f32 %v4584_v63, %v1306_v55 }
 0x258   :  { %v3581_v59 = vadd.f32 %v1219_v43, %v5350_v28  ;;  %v1221_v30 = vpop.f32.mrb[47].mxu0  ;;  %v1347_v62 = vadd.f32 %v1346_v33, %v1334_v42 }
 0x259   :  { %v3582_v61 = vadd.f32 %v1221_v30, %v5351_v34  ;;  %v1337_v37 = vmax.f32 %v4656_v60, 0.0 }
 0x25a   :  { %v1294_v45 = vmax.f32 %v3579_v41, %v3581_v59  ;;  %v1348_v0 = vadd.f32 %v1347_v62, %v1335_v44 }
 0x25b   :  { %v1295_v46 = vmax.f32 %v3580_v58, %v3582_v61 }
 0x25c   :  { %v1349_v47 = vadd.f32 %v1348_v0, %v1336_v36 }
 0x25d   :  { %v1307_v3 = vmax.f32 %v1294_v45, %v1295_v46 }
 0x25e   :  { %v1350_v23 = vadd.f32 %v1349_v47, %v1337_v37 }
 0x25f   :  { %v1326_v4 = vadd.f32 %v4584_v63, %v1307_v3  ;;  %v4674_v63 = vld [vmem:[%s5339_s13] sm:$0xff] }
 0x261   :  { %v1338_v5 = vmax.f32 %v1326_v4, 0.0 }
 0x263   :  { %v1351_v48 = vadd.f32 %v1350_v23, %v1338_v5 }
 0x265   :  { %v1352_v18 = vrot.slane %v1351_v48, 4 }
 0x267   :  { %v1353_v38 = vadd.f32 %v1352_v18, %v1351_v48 }
 0x269   :  { %v1354_v19 = vrot.slane %v1353_v38, 2 }
 0x26b   :  { %v1355_v8 = vadd.f32 %v1354_v19, %v1353_v38 }
 0x26d   :  { %v1356_v50 = vrot.slane %v1355_v8, 1 }
 0x26f   :  { %v1357_v35 = vadd.f32 %v1356_v50, %v1355_v8 }
 0x271   :  { %v1359_v22 = vmul.f32 %v1357_v35, %v4667_v27  ;;  %v1358_v2 = vmul.f32 %v1357_v35, %v4674_v63  ;;  %v3827_v35 = vld [vmem:[%s5328_s2 + $0x80] ss:$8 sps:$4 sm:$0xff]  }
 0x273   :  { %v1363_v20 = vsel %vm1362_vm3, %v1359_v22, 0.0  ;;  %v3829_v22 = vld [vmem:[%s5328_s2 + $0x84] ss:$8 sps:$4 sm:$0xff]  }
 0x274   :  { %1364 = vadd.xlane.f32.xlu0 %v1363_v20  ;;  %v3832_v20 = vld [vmem:[%s5328_s2 + $0x94] ss:$8 sps:$4 sm:$0xff]   ;;  %1639 = vmatprep.subr.bf16.mxu1 %v3829_v22 }
 0x275   :  { %1640 = vmatpush1.bf16.msra.mxu1 %v3827_v35 }
 0x276   :  { %1641 = vmatprep.subr.bf16.mxu1 %v3832_v20 }
 0x278   :  { %1360 = vadd.xlane.f32.xlu0 %v1358_v2  ;;  %v3830_v2 = vld [vmem:[%s5328_s2 + $0x90] ss:$8 sps:$4 sm:$0xff]  }
 0x279   :  { %1642 = vmatpush1.bf16.msra.mxu1 %v3830_v2 }
 0x301   :  { %v1365_v9 = vpop.xlane.xlu0 %1364 }
 0x302   :  { %v1367_v13 = vmul.f32 0.00086805556, %v1365_v9  ;;  %v3835_v9 = vld [vmem:[%s5328_s2 + $0xa4] ss:$8 sps:$4 sm:$0xff]  }
 0x303   :  { %1643 = vmatprep.subr.bf16.mxu1 %v3835_v9 }
 0x304   :  { %v1369_v53 = vmul.f32 %v1367_v13, %v4667_v27  ;;  %v3833_v13 = vld [vmem:[%s5328_s2 + $0xa0] ss:$8 sps:$4 sm:$0xff]  }
 0x305   :  { %v1361_v32 = vpop.xlane.xlu0 %1360  ;;  %1644 = vmatpush1.bf16.msra.mxu1 %v3833_v13 }
 0x306   :  { %v1366_v11 = vmul.f32 0.00086805556, %v1361_v32  ;;  %v1370_v15 = vsel %vm1362_vm3, %v1369_v53, 0.0  ;;  %v3838_v53 = vld [vmem:[%s5328_s2 + $0xb4] ss:$8 sps:$4 sm:$0xff]  }
 0x307   :  { %v3836_v32 = vld [vmem:[%s5328_s2 + $0xb0] ss:$8 sps:$4 sm:$0xff]   ;;  %1645 = vmatprep.subr.bf16.mxu1 %v3838_v53 }
 0x308   :  { %v1368_v54 = vmul.f32 %v1366_v11, %v4674_v63  ;;  %v3841_v11 = vld [vmem:[%s5328_s2 + $0xc4] ss:$8 sps:$4 sm:$0xff]  }
 0x309   :  { %1646 = vmatpush1.bf16.msra.mxu1 %v3836_v32 }
 0x30a   :  { %v1371_v55 = vadd.f32 %v1370_v15, %v1368_v54  ;;  %v3839_v54 = vld [vmem:[%s5328_s2 + $0xc0] ss:$8 sps:$4 sm:$0xff]   ;;  %1647 = vmatprep.subr.bf16.mxu1 %v3841_v11  ;;  %v3844_v15 = vld [vmem:[%s5328_s2 + $0xd4] ss:$8 sps:$4 sm:$0xff]  }
 0x30c   :  { %v1372_v12 = vrot.slane %v1371_v55, 4 }
 0x30d   :  { %1648 = vmatpush1.bf16.msra.mxu1 %v3839_v54 }
 0x30e   :  { %v1373_v16 = vadd.f32 %v1372_v12, %v1371_v55  ;;  %v3842_v55 = vld [vmem:[%s5328_s2 + $0xd0] ss:$8 sps:$4 sm:$0xff]   ;;  %1649 = vmatprep.subr.bf16.mxu1 %v3844_v15 }
 0x310   :  { %v1374_v41 = vrot.slane %v1373_v16, 2 }
 0x311   :  { %1650 = vmatpush1.bf16.msra.mxu1 %v3842_v55 }
 0x312   :  { %v1375_v24 = vadd.f32 %v1374_v41, %v1373_v16 }
 0x314   :  { %v1376_v56 = vrot.slane %v1375_v24, 1 }
 0x316   :  { %v1377_v57 = vadd.f32 %v1376_v56, %v1375_v24 }
 0x318   :  { %v4682_v25 = vsub.f32 %v1327_v7, %v1377_v57  ;;  %v4686_v58 = vsub.f32 %v1328_v17, %v1377_v57  ;;  %v4690_v43 = vsub.f32 %v1329_v49, %v1377_v57  ;;  %v4698_v30 = vsub.f32 %v1330_v21, %v1377_v57 }
 0x319   :  { %v4702_v26 = vsub.f32 %v1331_v39, %v1377_v57  ;;  %v4708_v17 = vsub.f32 %v1332_v10, %v1377_v57  ;;  %v4714_v6 = vsub.f32 %v1333_v40, %v1377_v57  ;;  %v4720_v39 = vsub.f32 %v1334_v42, %v1377_v57 }
 0x31a   :  { %v1390_v28 = vmul.f32 %v4682_v25, %v4682_v25  ;;  %v1391_v59 = vmul.f32 %v4686_v58, %v4686_v58  ;;  %v1392_v1 = vmul.f32 %v4690_v43, %v4690_v43  ;;  %v1393_v7 = vmul.f32 %v4698_v30, %v4698_v30 }
 0x31b   :  { %v1394_v31 = vmul.f32 %v4702_v26, %v4702_v26  ;;  %v1395_v51 = vmul.f32 %v4708_v17, %v4708_v17  ;;  %v4724_v33 = vsub.f32 %v1335_v44, %v1377_v57  ;;  %v1396_v60 = vmul.f32 %v4714_v6, %v4714_v6 }
 0x31c   :  { %v1402_v29 = vadd.f32 %v1391_v59, %v1390_v28  ;;  %v4728_v40 = vsub.f32 %v1336_v36, %v1377_v57  ;;  %v1397_v34 = vmul.f32 %v4720_v39, %v4720_v39  ;;  %v4732_v45 = vsub.f32 %v1337_v37, %v1377_v57  ;;  %v1429_v28 = vld [vmem:[%s5333_s7 + $0x8] sm:$0x3] }
 0x31d   :  { %v1398_v14 = vmul.f32 %v4724_v33, %v4724_v33  ;;  %v4736_v62 = vsub.f32 %v1338_v5, %v1377_v57 }
 0x31e   :  { %v1403_v49 = vadd.f32 %v1402_v29, %v1392_v1  ;;  %v1399_v44 = vmul.f32 %v4728_v40, %v4728_v40  ;;  %v1400_v36 = vmul.f32 %v4732_v45, %v4732_v45  ;;  %v1428_v29 = vld [vmem:[%s5333_s7] sm:$0xff] }
 0x31f   :  { %v1401_v3 = vmul.f32 %v4736_v62, %v4736_v62 }
 0x320   :  { %v1404_v21 = vadd.f32 %v1403_v49, %v1393_v7 }
 0x322   :  { %v1405_v10 = vadd.f32 %v1404_v21, %v1394_v31  ;;  %v1457_v31 = vld [vmem:[%s5334_s8 + $0x8] sm:$0x3]  ;;  %v1456_v21 = vld [vmem:[%s5334_s8] sm:$0xff] }
 0x324   :  { %v1406_v52 = vadd.f32 %v1405_v10, %v1395_v51  ;;  %v3845_v51 = vld [vmem:[%s5328_s2 + $0xe0] ss:$8 sps:$4 sm:$0xff]   ;;  %v3847_v10 = vld [vmem:[%s5328_s2 + $0xe4] ss:$8 sps:$4 sm:$0xff]  }
 0x325   :  { %1651 = vmatprep.subr.bf16.mxu1 %v3847_v10 }
 0x326   :  { %v1407_v61 = vadd.f32 %v1406_v52, %v1396_v60  ;;  %1652 = vmatpush1.bf16.msra.mxu1 %v3845_v51  ;;  %v3848_v60 = vld [vmem:[%s5328_s2 + $0xf0] ss:$8 sps:$4 sm:$0xff]   ;;  %v3850_v52 = vld [vmem:[%s5328_s2 + $0xf4] ss:$8 sps:$4 sm:$0xff]   ;;  %v5352_v51 = vmov 0  }
 0x327   :  { %1653 = vmatprep.subr.bf16.mxu1 %v3850_v52  ;;  %v3859_v52 = vld [vmem:[%s5328_s2 + $0x24] ss:$8 sps:$4 sm:$0xff]  }
 0x328   :  { %v1408_v42 = vadd.f32 %v1407_v61, %v1397_v34  ;;  %v3853_v34 = vld [vmem:[%s5328_s2 + $0x4] ss:$8 sps:$4 sm:$0xff]  }
 0x32a   :  { %v1409_v46 = vadd.f32 %v1408_v42, %v1398_v14  ;;  %1654 = vmatpush1.bf16.msra.mxu1 %v3848_v60 }
 0x32b   :  { %1792 = vmatprep.subr.bf16.mxu1 %v3853_v34 }
 0x32c   :  { %v1410_v0 = vadd.f32 %v1409_v46, %v1399_v44 }
 0x32e   :  { %v1411_v47 = vadd.f32 %v1410_v0, %v1400_v36 }
 0x330   :  { %v1412_v37 = vadd.f32 %v1411_v47, %v1401_v3 }
 0x332   :  { %v1413_v4 = vrot.slane %v1412_v37, 4 }
 0x334   :  { %v1414_v23 = vadd.f32 %v1413_v4, %v1412_v37 }
 0x336   :  { %v1415_v48 = vrot.slane %v1414_v23, 2 }
 0x338   :  { %v1416_v18 = vadd.f32 %v1415_v48, %v1414_v23 }
 0x33a   :  { %v1417_v38 = vrot.slane %v1416_v18, 1 }
 0x33c   :  { %v1418_v5 = vadd.f32 %v1417_v38, %v1416_v18 }
 0x33e   :  { %v1420_v19 = vmul.f32 %v1418_v5, %v4667_v27  ;;  %v1419_v50 = vmul.f32 %v1418_v5, %v4674_v63 }
 0x340   :  { %v1423_v8 = vsel %vm1362_vm3, %v1420_v19, 0.0 }
 0x341   :  { %1424 = vadd.xlane.f32.xlu1 %v1423_v8 }
 0x345   :  { %1421 = vadd.xlane.f32.xlu1 %v1419_v50 }
 0x3ce   :  { %v1425_v12 = vpop.xlane.xlu1 %1424 }
 0x3cf   :  { %v1427_v16 = vmul.f32 0.00086805556, %v1425_v12 }
 0x3d1   :  { %v1431_v41 = vadd.f32 1e-05, %v1427_v16 }
 0x3d2   :  { %v1422_v24 = vpop.xlane.xlu1 %1421 }
 0x3d3   :  { %3979 = vrsqrt.f32 %v1431_v41  ;;  %v1426_v56 = vmul.f32 0.00086805556, %v1422_v24 }
 0x3d5   :  { %v1430_v57 = vadd.f32 1e-05, %v1426_v56 }
 0x3d7   :  { %3981 = vrsqrt.f32 %v1430_v57 }
 0x3dd   :  { %v3980_v59 = vpop.eup %3979 }
 0x3de   :  { %v1435_v1 = vmul.f32 %v3980_v59, %v1429_v28  ;;  %v3851_v59 = vld [vmem:[%s5328_s2] ss:$8 sps:$4 sm:$0xff]  }
 0x3e0   :  { %1443 = vperm.xlu0 %3795, %v1435_v1  }
 0x3e1   :  { %v3982_v7 = vpop.eup %3981 }
 0x3e2   :  { %v1434_v49 = vmul.f32 %v3982_v7, %v1428_v29 }
 0x3e4   :  { %1438 = vperm.xlu1 %3796, %v1434_v49  }
 0x3e8   :  { %1465 = vperm.xlu1 %3796, %v1457_v31  }
 0x3ec   :  { %1460 = vperm.xlu1 %3796, %v1456_v21   ;;  %v3854_v21 = vld [vmem:[%s5328_s2 + $0x10] ss:$8 sps:$4 sm:$0xff]  }
 0x45f   :  { %v1444_v61 = vpop.permute.xlu0 %1443 }
 0x460   :  { %v1447_v14 = vmul.f32 %v1444_v61, %v4667_v27 }
 0x462   :  { %v1448_v46 = vsel %vm1362_vm3, %v1447_v14, 0.0 }
 0x463   :  { %v1439_v42 = vpop.permute.xlu1 %1438 }
 0x464   :  { %v1446_v44 = vmul.f32 %v1439_v42, %v4674_v63 }
 0x466   :  { %v1449_v36 = vadd.f32 %v1448_v46, %v1446_v44  ;;  %v3857_v44 = vld [vmem:[%s5328_s2 + $0x20] ss:$8 sps:$4 sm:$0xff]  }
 0x467   :  { %v1466_v0 = vpop.permute.xlu1 %1465 }
 0x468   :  { %v1450_v3 = vrot.slane %v1449_v36, 4  ;;  %v1469_v47 = vmul.f32 %v1466_v0, %v4667_v27  ;;  %v3865_v0 = vld [vmem:[%s5328_s2 + $0x44] ss:$8 sps:$4 sm:$0xff]  }
 0x46a   :  { %v1451_v37 = vadd.f32 %v1450_v3, %v1449_v36  ;;  %v1470_v18 = vsel %vm1362_vm3, %v1469_v47, 0.0  ;;  %v3860_v36 = vld [vmem:[%s5328_s2 + $0x30] ss:$8 sps:$4 sm:$0xff]   ;;  %v3863_v47 = vld [vmem:[%s5328_s2 + $0x40] ss:$8 sps:$4 sm:$0xff]  }
 0x46b   :  { %v1461_v4 = vpop.permute.xlu1 %1460 }
 0x46c   :  { %v1452_v23 = vrot.slane %v1451_v37, 2  ;;  %v1468_v48 = vmul.f32 %v1461_v4, %v4674_v63 }
 0x46e   :  { %v1453_v38 = vadd.f32 %v1452_v23, %v1451_v37  ;;  %v1471_v5 = vadd.f32 %v1470_v18, %v1468_v48  ;;  %v3868_v37 = vld [vmem:[%s5328_s2 + $0x54] ss:$8 sps:$4 sm:$0xff]   ;;  %v3866_v23 = vld [vmem:[%s5328_s2 + $0x50] ss:$8 sps:$4 sm:$0xff]   ;;  %v3871_v48 = vld [vmem:[%s5328_s2 + $0x64] ss:$8 sps:$4 sm:$0xff]  }
 0x46f   :  { %v3869_v18 = vld [vmem:[%s5328_s2 + $0x60] ss:$8 sps:$4 sm:$0xff]  }
 0x470   :  { %v1472_v19 = vrot.slane %v1471_v5, 4  ;;  %v1454_v8 = vrot.slane %v1453_v38, 1 }
 0x472   :  { %v1473_v50 = vadd.f32 %v1472_v19, %v1471_v5  ;;  %v1455_v22 = vadd.f32 %v1454_v8, %v1453_v38  ;;  %v3874_v38 = vld [vmem:[%s5328_s2 + $0x74] ss:$8 sps:$4 sm:$0xff]   ;;  %v3872_v19 = vld [vmem:[%s5328_s2 + $0x70] ss:$8 sps:$4 sm:$0xff]   ;;  %v3877_v8 = vld [vmem:[%s5328_s2 + $0x104] ss:$8 sps:$4 sm:$0xff]  }
 0x474   :  { %v1474_v35 = vrot.slane %v1473_v50, 2  ;;  %v1478_v9 = vmul.f32 %v1455_v22, %v4682_v25  ;;  %v1479_v27 = vmul.f32 %v1455_v22, %v4686_v58  ;;  %v1480_v53 = vmul.f32 %v1455_v22, %v4690_v43 }
 0x475   :  { %v1481_v63 = vmul.f32 %v1455_v22, %v4698_v30  ;;  %v1482_v32 = vmul.f32 %v1455_v22, %v4702_v26  ;;  %v1483_v11 = vmul.f32 %v1455_v22, %v4708_v17  ;;  %v1486_v54 = vmul.f32 %v1455_v22, %v4724_v33 }
 0x476   :  { %v1475_v20 = vadd.f32 %v1474_v35, %v1473_v50  ;;  %v1487_v15 = vmul.f32 %v1455_v22, %v4728_v40  ;;  %v1488_v58 = vmul.f32 %v1455_v22, %v4732_v45  ;;  %v1489_v43 = vmul.f32 %v1455_v22, %v4736_v62  ;;  %v3856_v45 = vld [vmem:[%s5328_s2 + $0x14] ss:$8 sps:$4 sm:$0xff]   ;;  %v3875_v50 = vld [vmem:[%s5328_s2 + $0x100] ss:$8 sps:$4 sm:$0xff]  }
 0x477   :  { %v1484_v10 = vmul.f32 %v1455_v22, %v4714_v6  ;;  %v1485_v60 = vmul.f32 %v1455_v22, %v4720_v39  ;;  %v3862_v6 = vld [vmem:[%s5328_s2 + $0x34] ss:$8 sps:$4 sm:$0xff]   ;;  %v3878_v22 = vld [vmem:[%s5328_s2 + $0x110] ss:$8 sps:$4 sm:$0xff]  }
 0x478   :  { %v1476_v2 = vrot.slane %v1475_v20, 1  ;;  %v3880_v35 = vld [vmem:[%s5328_s2 + $0x114] ss:$8 sps:$4 sm:$0xff]  }
 0x47a   :  { %v1477_v13 = vadd.f32 %v1476_v2, %v1475_v20  ;;  %v3883_v20 = vld [vmem:[%s5328_s2 + $0x124] ss:$8 sps:$4 sm:$0xff]   ;;  %v3881_v2 = vld [vmem:[%s5328_s2 + $0x120] ss:$8 sps:$4 sm:$0xff]  }
 0x47c   :  { %v1490_v55 = vadd.f32 %v1478_v9, %v1477_v13  ;;  %v1491_v12 = vadd.f32 %v1479_v27, %v1477_v13  ;;  %v1492_v16 = vadd.f32 %v1480_v53, %v1477_v13  ;;  %v1493_v41 = vadd.f32 %v1481_v63, %v1477_v13  ;;  %v3886_v9 = vld [vmem:[%s5328_s2 + $0x134] ss:$8 sps:$4 sm:$0xff]   ;;  %v3889_v27 = vld [vmem:[%s5328_s2 + $0x144] ss:$8 sps:$4 sm:$0xff]   ;;  %v3887_v53 = vld [vmem:[%s5328_s2 + $0x140] ss:$8 sps:$4 sm:$0xff]  }
 0x47d   :  { %v1494_v25 = vadd.f32 %v1482_v32, %v1477_v13  ;;  %v1495_v24 = vadd.f32 %v1483_v11, %v1477_v13  ;;  %v1498_v26 = vadd.f32 %v1486_v54, %v1477_v13  ;;  %v1499_v17 = vadd.f32 %v1487_v15, %v1477_v13  ;;  %v3892_v63 = vld [vmem:[%s5328_s2 + $0x154] ss:$8 sps:$4 sm:$0xff]   ;;  %v3890_v32 = vld [vmem:[%s5328_s2 + $0x150] ss:$8 sps:$4 sm:$0xff]   ;;  %v3895_v11 = vld [vmem:[%s5328_s2 + $0x164] ss:$8 sps:$4 sm:$0xff]  }
 0x47e   :  { %v4826_v56 = vpack.c.bf16 %v1491_v12, %v1490_v55  ;;  %v4828_v30 = vpack.c.bf16 %v1493_v41, %v1492_v16  ;;  %v1500_v57 = vadd.f32 %v1488_v58, %v1477_v13  ;;  %v1501_v33 = vadd.f32 %v1489_v43, %v1477_v13  ;;  %v3893_v54 = vld [vmem:[%s5328_s2 + $0x160] ss:$8 sps:$4 sm:$0xff]   ;;  %v3898_v15 = vld [vmem:[%s5328_s2 + $0x174] ss:$8 sps:$4 sm:$0xff]   ;;  %v3896_v55 = vld [vmem:[%s5328_s2 + $0x170] ss:$8 sps:$4 sm:$0xff]  }
 0x47f   :  { %v4835_v1 = vpack.c.bf16 %v1499_v17, %v1498_v26  ;;  %v4843_v7 = vpack.c.bf16 %v1495_v24, %v1494_v25  ;;  %v1496_v14 = vadd.f32 %v1484_v10, %v1477_v13  ;;  %v1497_v42 = vadd.f32 %v1485_v60, %v1477_v13  ;;  %v3884_v13 = vld [vmem:[%s5328_s2 + $0x130] ss:$8 sps:$4 sm:$0xff]   ;;  %v3901_v12 = vld [vmem:[%s5328_s2 + $0x184] ss:$8 sps:$4 sm:$0xff]   ;;  %v3899_v16 = vld [vmem:[%s5328_s2 + $0x180] ss:$8 sps:$4 sm:$0xff]  }
 0x480   :  { %v1546_v40 = vrot.slane %v4826_v56, 4  ;;  %v1547_v28 = vrot.slane %v4828_v30, 4  ;;  %v4840_v62 = vpack.c.bf16 %v1501_v33, %v1500_v57  ;;  %v3904_v41 = vld [vmem:[%s5328_s2 + $0x194] ss:$8 sps:$4 sm:$0xff]   ;;  %v3902_v25 = vld [vmem:[%s5328_s2 + $0x190] ss:$8 sps:$4 sm:$0xff]  }
 0x481   :  { %v1553_v49 = vrot.slane %v4835_v1, 4  ;;  %v1549_v61 = vrot.slane %v4843_v7, 4  ;;  %v4869_v46 = vpack.c.bf16 %v1497_v42, %v1496_v14  ;;  %v3907_v24 = vld [vmem:[%s5328_s2 + $0x1a4] ss:$8 sps:$4 sm:$0xff]   ;;  %v3905_v58 = vld [vmem:[%s5328_s2 + $0x1a0] ss:$8 sps:$4 sm:$0xff]  }
 0x482   :  { %v1548_v29 = vsel %vm116_vm2, %v1546_v40, %v1547_v28  ;;  %v2069_v31 = vrot.slane %v4840_v62, 4  ;;  %v3910_v43 = vld [vmem:[%s5328_s2 + $0x1b4] ss:$8 sps:$4 sm:$0xff]   ;;  %v3911_v26 = vld [vmem:[%s5328_s2 + $0x1c0] ss:$8 sps:$4 sm:$0xff]  }
 0x483   :  { %1672 = vmatmul.mubr.bf16.vlgmr.msra.gmra.mrb[48].mxu1 %v1548_v29  ;;  %v4867_v39 = vsel %vm116_vm2, %v1547_v28, %v1549_v61  ;;  %v1551_v3 = vrot.slane %v4869_v46, 4  ;;  %v3916_v17 = vld [vmem:[%s5328_s2 + $0x1d4] ss:$8 sps:$4 sm:$0xff]   ;;  %v3914_v57 = vld [vmem:[%s5328_s2 + $0x1d0] ss:$8 sps:$4 sm:$0xff]  }
 0x484   :  { %1793 = vmatpush1.bf16.msra.mxu1 %v3851_v59  ;;  %1681 = vmatprep.mubr.bf16.mxu1 %v5352_v51  ;;  %v4857_v34 = vsel %vm116_vm2, %v1553_v49, %v2069_v31  ;;  %v3919_v33 = vld [vmem:[%s5328_s2 + $0x1e4] ss:$8 sps:$4 sm:$0xff]   ;;  %v3917_v40 = vld [vmem:[%s5328_s2 + $0x1e0] ss:$8 sps:$4 sm:$0xff]   ;;  %v3922_v28 = vld [vmem:[%s5328_s2 + $0x1f4] ss:$8 sps:$4 sm:$0xff]  }
 0x485   :  { %1794 = vmatprep.subr.bf16.mxu1 %v3856_v45  ;;  %v4887_v4 = vsel %vm116_vm2, %v1549_v61, %v1551_v3  ;;  %v4904_v5 = vsel %vm116_vm2, %v1551_v3, %v1553_v49  ;;  %v3920_v59 = vld [vmem:[%s5328_s2 + $0x1f0] ss:$8 sps:$4 sm:$0xff]   ;;  %v3925_v45 = vld [vmem:[%s5328_s2 + $0x204] ss:$8 sps:$4 sm:$0xff]   ;;  %v3923_v29 = vld [vmem:[%s5328_s2 + $0x200] ss:$8 sps:$4 sm:$0xff]  }
 0x486   :  { %v3928_v49 = vld [vmem:[%s5328_s2 + $0x214] ss:$8 sps:$4 sm:$0xff]   ;;  %v3926_v31 = vld [vmem:[%s5328_s2 + $0x210] ss:$8 sps:$4 sm:$0xff]   ;;  %v3929_v10 = vld [vmem:[%s5328_s2 + $0x220] ss:$8 sps:$4 sm:$0xff]  }
 0x487   :  { %v3934_v60 = vld [vmem:[%s5328_s2 + $0x234] ss:$8 sps:$4 sm:$0xff]   ;;  %v3937_v61 = vld [vmem:[%s5328_s2 + $0x244] ss:$8 sps:$4 sm:$0xff]   ;;  %v3935_v14 = vld [vmem:[%s5328_s2 + $0x240] ss:$8 sps:$4 sm:$0xff]  }
 0x488   :  { %1795 = vmatpush1.bf16.msra.mxu1 %v3854_v21  ;;  %v3931_v21 = vld [vmem:[%s5328_s2 + $0x224] ss:$8 sps:$4 sm:$0xff]   ;;  %v3940_v42 = vld [vmem:[%s5328_s2 + $0x254] ss:$8 sps:$4 sm:$0xff]  }
 0x489   :  { %1796 = vmatprep.subr.bf16.mxu1 %v3859_v52  ;;  %v3932_v52 = vld [vmem:[%s5328_s2 + $0x230] ss:$8 sps:$4 sm:$0xff]  }
 0x48b   :  { %1682 = vmatmul.mubr.bf16.gmra.mrb[52].mxu1 %v4867_v39 }
 0x48c   :  { %1797 = vmatpush1.bf16.msra.mxu1 %v3857_v44  ;;  %1691 = vmatprep.mubr.bf16.mxu1 %v5352_v51  ;;  %v3938_v44 = vld [vmem:[%s5328_s2 + $0x250] ss:$8 sps:$4 sm:$0xff]  }
 0x48d   :  { %1798 = vmatprep.subr.bf16.mxu1 %v3862_v6  ;;  %v3943_v6 = vld [vmem:[%s5328_s2 + $0x264] ss:$8 sps:$4 sm:$0xff]  }
 0x490   :  { %1799 = vmatpush1.bf16.msra.mxu1 %v3860_v36  ;;  %v3946_v36 = vld [vmem:[%s5328_s2 + $0x274] ss:$8 sps:$4 sm:$0xff]  }
 0x491   :  { %1800 = vmatprep.subr.bf16.mxu1 %v3865_v0  ;;  %v3944_v0 = vld [vmem:[%s5328_s2 + $0x270] ss:$8 sps:$4 sm:$0xff]  }
 0x493   :  { %1692 = vmatmul.mubr.bf16.gmra.mrb[56].mxu1 %v4887_v4 }
 0x494   :  { %1801 = vmatpush1.bf16.msra.mxu1 %v3863_v47  ;;  %1701 = vmatprep.mubr.bf16.mxu1 %v5352_v51 }
 0x495   :  { %1802 = vmatprep.subr.bf16.mxu1 %v3868_v37 }
 0x498   :  { %1803 = vmatpush1.bf16.msra.mxu1 %v3866_v23 }
 0x499   :  { %1804 = vmatprep.subr.bf16.mxu1 %v3871_v48 }
 0x49b   :  { %1702 = vmatmul.mubr.bf16.gmra.mrb[60].mxu1 %v4904_v5 }
 0x49c   :  { %1805 = vmatpush1.bf16.msra.mxu1 %v3869_v18  ;;  %1824 = vmatprep.mubr.bf16.mxu1 %v5352_v51 }
 0x49d   :  { %1806 = vmatprep.subr.bf16.mxu1 %v3874_v38 }
 0x4a0   :  { %1807 = vmatpush1.bf16.msra.mxu1 %v3872_v19 }
 0x4a1   :  { %1962 = vmatprep.subr.bf16.mxu1 %v3877_v8 }
 0x4a3   :  { %1825 = vmatmul.mubr.bf16.vlgmr.msra.gmra.mrb[48].mxu1 %v4826_v56  ;;  %v3908_v56 = vld [vmem:[%s5328_s2 + $0x1b0] ss:$8 sps:$4 sm:$0xff]  }
 0x4a4   :  { %1963 = vmatpush1.bf16.msra.mxu1 %v3875_v50  ;;  %1834 = vmatprep.mubr.bf16.mxu1 %v5352_v51 }
 0x4a5   :  { %1964 = vmatprep.subr.bf16.mxu1 %v3880_v35 }
 0x4a8   :  { %1965 = vmatpush1.bf16.msra.mxu1 %v3878_v22 }
 0x4a9   :  { %1966 = vmatprep.subr.bf16.mxu1 %v3883_v20 }
 0x4ab   :  { %1835 = vmatmul.mubr.bf16.gmra.mrb[52].mxu1 %v4828_v30 }
 0x4ac   :  { %1967 = vmatpush1.bf16.msra.mxu1 %v3881_v2  ;;  %1844 = vmatprep.mubr.bf16.mxu1 %v5352_v51  ;;  %v3336_v2 = vld [vmem:[%s5331_s5] ss:$0 sm:$0xff] }
 0x4ad   :  { %1968 = vmatprep.subr.bf16.mxu1 %v3886_v9 }
 0x4b0   :  { %1969 = vmatpush1.bf16.msra.mxu1 %v3884_v13 }
 0x4b1   :  { %1970 = vmatprep.subr.bf16.mxu1 %v3889_v27 }
 0x4b3   :  { %1845 = vmatmul.mubr.bf16.gmra.mrb[56].mxu1 %v4843_v7 }
 0x4b4   :  { %1971 = vmatpush1.bf16.msra.mxu1 %v3887_v53  ;;  %1854 = vmatprep.mubr.bf16.mxu1 %v5352_v51 }
 0x4b5   :  { %1972 = vmatprep.subr.bf16.mxu1 %v3892_v63 }
 0x4b8   :  { %1973 = vmatpush1.bf16.msra.mxu1 %v3890_v32 }
 0x4b9   :  { %1974 = vmatprep.subr.bf16.mxu1 %v3895_v11 }
 0x4bb   :  { %1855 = vmatmul.mubr.bf16.gmra.mrb[60].mxu1 %v4869_v46 }
 0x4bc   :  { %1975 = vmatpush1.bf16.msra.mxu1 %v3893_v54  ;;  %1994 = vmatprep.mubr.bf16.mxu1 %v5352_v51 }
 0x4bd   :  { %1976 = vmatprep.subr.bf16.mxu1 %v3898_v15 }
 0x4c0   :  { %1977 = vmatpush1.bf16.msra.mxu1 %v3896_v55 }
 0x4c1   :  { %2152 = vmatprep.subr.bf16.mxu1 %v3901_v12 }
 0x4c3   :  { %1995 = vmatmul.mubr.bf16.vlgmr.msra.gmra.mrb[48].mxu1 %v4828_v30  ;;  %v3913_v30 = vld [vmem:[%s5328_s2 + $0x1c4] ss:$8 sps:$4 sm:$0xff]  }
 0x4c4   :  { %2153 = vmatpush1.bf16.msra.mxu1 %v3899_v16  ;;  %2004 = vmatprep.mubr.bf16.mxu1 %v5352_v51 }
 0x4c5   :  { %2154 = vmatprep.subr.bf16.mxu1 %v3904_v41 }
 0x4c8   :  { %2155 = vmatpush1.bf16.msra.mxu1 %v3902_v25 }
 0x4c9   :  { %2156 = vmatprep.subr.bf16.mxu1 %v3907_v24 }
 0x4cb   :  { %2005 = vmatmul.mubr.bf16.gmra.mrb[52].mxu1 %v4843_v7 }
 0x4cc   :  { %2157 = vmatpush1.bf16.msra.mxu1 %v3905_v58  ;;  %2014 = vmatprep.mubr.bf16.mxu1 %v5352_v51 }
 0x4cd   :  { %2158 = vmatprep.subr.bf16.mxu1 %v3910_v43 }
 0x4d0   :  { %2159 = vmatpush1.bf16.msra.mxu1 %v3908_v56 }
 0x4d1   :  { %2160 = vmatprep.subr.bf16.mxu1 %v3913_v30 }
 0x4d3   :  { %2015 = vmatmul.mubr.bf16.gmra.mrb[56].mxu1 %v4869_v46 }
 0x4d4   :  { %2161 = vmatpush1.bf16.msra.mxu1 %v3911_v26  ;;  %2024 = vmatprep.mubr.bf16.mxu1 %v5352_v51 }
 0x4d5   :  { %2162 = vmatprep.subr.bf16.mxu1 %v3916_v17 }
 0x4d8   :  { %2163 = vmatpush1.bf16.msra.mxu1 %v3914_v57 }
 0x4d9   :  { %2164 = vmatprep.subr.bf16.mxu1 %v3919_v33 }
 0x4db   :  { %2025 = vmatmul.mubr.bf16.gmra.mrb[60].mxu1 %v4835_v1 }
 0x4dc   :  { %2165 = vmatpush1.bf16.msra.mxu1 %v3917_v40  ;;  %2184 = vmatprep.mubr.bf16.mxu1 %v5352_v51  ;;  %v5092_v40 = vld [vmem:[%s5340_s14 + $0x8] sm:$0xff] }
 0x4dd   :  { %2166 = vmatprep.subr.bf16.mxu1 %v3922_v28  ;;  %v5097_v28 = vld [vmem:[%s5340_s14] sm:$0xff] }
 0x4e0   :  { %2167 = vmatpush1.bf16.msra.mxu1 %v3920_v59 }
 0x4e1   :  { %2338 = vmatprep.subr.bf16.mxu1 %v3925_v45  ;;  %v5102_v45 = vld [vmem:[%s5340_s14 + $0x10] sm:$0xf]  ;;  %s4018_s14 = smov [#allocation2]  }
 0x4e2   :  { %s3082_s20 = sshll.u32 %s4018_s14, 4  ;;  %s3083_s20 = int_to_ptr.vmem [resolvable:$true] %s3082_s20 }
 0x4e3   :  { %2185 = vmatmul.mubr.bf16.vlgmr.msra.gmra.mrb[48].mxu1 %v4867_v39  ;;  %v3941_v39 = vld [vmem:[%s5328_s2 + $0x260] ss:$8 sps:$4 sm:$0xff]   ;;  %s3991_s21 = scalar_lea.vmem %s3083_s20, 128  ;;  %p3996_p1 = scmp.lt.s32.totalorder %s3083_s20, %s3083_s20 }
 0x4e4   :  { %2339 = vmatpush1.bf16.msra.mxu1 %v3923_v29  ;;  %2194 = vmatprep.mubr.bf16.mxu1 %v5352_v51  ;;  %p3992_p0 = scmp.ne.s32.totalorder %s3083_s20, %s3991_s21  ;;  %p3997_p2 = scmp.lt.s32.totalorder %s3991_s21, %s3991_s21 }
 0x4e5   :  { %2340 = vmatprep.subr.bf16.mxu1 %v3928_v49 }
 0x4e6   :  { %p3998_p3 = por %p3997_p2, %p3996_p1 }
 0x4e8   :  { %2341 = vmatpush1.bf16.msra.mxu1 %v3926_v31  ;;  %p3999_p4 = pnand %p3998_p3, %p3992_p0 }
 0x4e9   :  { %2342 = vmatprep.subr.bf16.mxu1 %v3931_v21 }
 0x4eb   :  { %2195 = vmatmul.mubr.bf16.gmra.mrb[52].mxu1 %v4887_v4 }
 0x4ec   :  { %2343 = vmatpush1.bf16.msra.mxu1 %v3929_v10  ;;  %2204 = vmatprep.mubr.bf16.mxu1 %v5352_v51  ;;  %v2561_v10 = vld [vmem:[%s5336_s10] sm:$0xff] }
 0x4ed   :  { %2344 = vmatprep.subr.bf16.mxu1 %v3934_v60 }
 0x4f0   :  { %2345 = vmatpush1.bf16.msra.mxu1 %v3932_v52 }
 0x4f1   :  { %2346 = vmatprep.subr.bf16.mxu1 %v3937_v61 }
 0x4f3   :  { %2205 = vmatmul.mubr.bf16.gmra.mrb[56].mxu1 %v4904_v5 }
 0x4f4   :  { %2347 = vmatpush1.bf16.msra.mxu1 %v3935_v14  ;;  %2214 = vmatprep.mubr.bf16.mxu1 %v5352_v51 }
 0x4f5   :  { %2348 = vmatprep.subr.bf16.mxu1 %v3940_v42 }
 0x4f8   :  { %2349 = vmatpush1.bf16.msra.mxu1 %v3938_v44 }
 0x4f9   :  { %2350 = vmatprep.subr.bf16.mxu1 %v3943_v6 }
 0x4fb   :  { %2215 = vmatmul.mubr.bf16.gmra.mrb[60].mxu1 %v4857_v34 }
 0x4fc   :  { %2351 = vmatpush1.bf16.msra.mxu1 %v3941_v39  ;;  %2370 = vmatprep.mubr.bf16.mxu1 %v5352_v51 }
 0x4fd   :  { %2352 = vmatprep.subr.bf16.mxu1 %v3946_v36 }
 0x500   :  { %2353 = vmatpush1.bf16.msra.mxu1 %v3944_v0 }
 0x503   :  { %2371 = vmatmul.mubr.bf16.vlgmr.msra.gmra.mrb[48].mxu1 %v4843_v7 }
 0x504   :  { %2380 = vmatprep.mubr.bf16.mxu1 %v5352_v51 }
 0x50b   :  { %2381 = vmatmul.mubr.bf16.gmra.mrb[52].mxu1 %v4869_v46 }
 0x50c   :  { %2390 = vmatprep.mubr.bf16.mxu1 %v5352_v51 }
 0x513   :  { %2391 = vmatmul.mubr.bf16.gmra.mrb[56].mxu1 %v4835_v1 }
 0x514   :  { %2400 = vmatprep.mubr.bf16.mxu1 %v5352_v51 }
 0x51b   :  { %2401 = vmatmul.mubr.bf16.gmra.mrb[60].mxu1 %v4840_v62 }
 0x5d6   :  { %v2372_v34 = vpop.f32.mrb[48].mxu1 }
 0x5d7   :  { %v2374_v3 = vpop.f32.mrb[49].mxu1 }
 0x5d8   :  { %v2376_v47 = vpop.f32.mrb[50].mxu1 }
 0x5d9   :  { %v2427_v37 = vmax.f32 %v2372_v34, %v2376_v47  ;;  %v2378_v4 = vpop.f32.mrb[51].mxu1 }
 0x5da   :  { %v2428_v23 = vmax.f32 %v2374_v3, %v2378_v4 }
 0x5dc   :  { %v2435_v48 = vmax.f32 %v2427_v37, %v2428_v23 }
 0x5de   :  { %v2382_v7 = vpop.f32.mrb[52].mxu1  ;;  %v2446_v53 = vadd.f32 %v3336_v2, %v2435_v48 }
 0x5df   :  { %v2384_v18 = vpop.f32.mrb[53].mxu1 }
 0x5e0   :  { %v2386_v38 = vpop.f32.mrb[54].mxu1  ;;  %v2450_v12 = vmax.f32 %v2446_v53, 0.0 }
 0x5e1   :  { %v2429_v5 = vmax.f32 %v2382_v7, %v2386_v38  ;;  %v2388_v46 = vpop.f32.mrb[55].mxu1 }
 0x5e2   :  { %v2430_v19 = vmax.f32 %v2384_v18, %v2388_v46 }
 0x5e4   :  { %v2436_v8 = vmax.f32 %v2429_v5, %v2430_v19 }
 0x5e6   :  { %v2392_v50 = vpop.f32.mrb[56].mxu1  ;;  %v2447_v9 = vadd.f32 %v3336_v2, %v2436_v8 }
 0x5e7   :  { %v2394_v1 = vpop.f32.mrb[57].mxu1 }
 0x5e8   :  { %v2396_v35 = vpop.f32.mrb[58].mxu1  ;;  %v2451_v15 = vmax.f32 %v2447_v9, 0.0 }
 0x5e9   :  { %v2431_v51 = vmax.f32 %v2392_v50, %v2396_v35  ;;  %v2398_v22 = vpop.f32.mrb[59].mxu1 }
 0x5ea   :  { %v2432_v62 = vmax.f32 %v2394_v1, %v2398_v22  ;;  %v2457_v25 = vadd.f32 %v2451_v15, %v2450_v12 }
 0x5ec   :  { %v2437_v20 = vmax.f32 %v2431_v51, %v2432_v62 }
 0x5ee   :  { %v2402_v13 = vpop.f32.mrb[60].mxu1  ;;  %v2448_v63 = vadd.f32 %v3336_v2, %v2437_v20 }
 0x5ef   :  { %v2404_v27 = vpop.f32.mrb[61].mxu1 }
 0x5f0   :  { %v2406_v32 = vpop.f32.mrb[62].mxu1  ;;  %v2452_v16 = vmax.f32 %v2448_v63, 0.0 }
 0x5f1   :  { %v2433_v11 = vmax.f32 %v2402_v13, %v2406_v32  ;;  %v2408_v54 = vpop.f32.mrb[63].mxu1 }
 0x5f2   :  { %v2434_v55 = vmax.f32 %v2404_v27, %v2408_v54  ;;  %v2458_v58 = vadd.f32 %v2457_v25, %v2452_v16 }
 0x5f4   :  { %v2438_v41 = vmax.f32 %v2433_v11, %v2434_v55 }
 0x5f6   :  { %v2449_v24 = vadd.f32 %v3336_v2, %v2438_v41 }
 0x5f8   :  { %v2453_v43 = vmax.f32 %v2449_v24, 0.0 }
 0x5fa   :  { %v2459_v56 = vadd.f32 %v2458_v58, %v2453_v43 }
 0x5fc   :  { %v2460_v30 = vrot.slane %v2459_v56, 4 }
 0x5fe   :  { %v2461_v26 = vadd.f32 %v2460_v30, %v2459_v56 }
 0x600   :  { %v2462_v17 = vrot.slane %v2461_v26, 2 }
 0x602   :  { %v2463_v57 = vadd.f32 %v2462_v17, %v2461_v26  ;;  %v2523_v26 = vld [vmem:[%s5335_s9 + $0x8] sm:$0xff] }
 0x604   :  { %v2464_v33 = vrot.slane %v2463_v57, 1 }
 0x606   :  { %v2465_v59 = vadd.f32 %v2464_v33, %v2463_v57  ;;  %v2563_v57 = vld [vmem:[%s5336_s10 + $0x10] sm:$0xf]  ;;  %v4016_v33 = vmov 0.0  }
 0x607   :  { %3455 = vmatprep.subr.bf16.mxu1 %v4016_v33  ;;  %3471 = vmatprep.mubr.msk.bf16.mxu1 %vm4017_vm4, %v4016_v33 }
 0x608   :  { %v2467_v29 = vmul.f32 %v2465_v59, %v5092_v40  ;;  %v2466_v49 = vmul.f32 %v2465_v59, %v5097_v28  ;;  %v2468_v31 = vmul.f32 %v2465_v59, %v5102_v45 }
 0x60a   :  { %2471 = vadd.xlane.f32.xlu0 %v2467_v29  ;;  %2469 = vadd.xlane.f32.xlu1 %v2466_v49  ;;  %v2474_v21 = vsel %vm116_vm2, %v2468_v31, 0.0  ;;  %v2524_v29 = vld [vmem:[%s5335_s9 + $0x10] sm:$0xf]  ;;  %v3947_v31 = vld [vmem:[%s5329_s3 + $0x40] sm:$0xff]  }
 0x60b   :  { %3456 = vmatpush3.bf16.msra.mxu1 %v3947_v31  ;;  %v3967_v31 = vld [vmem:[%s5329_s3 + $0xa0] sm:$0xff]  }
 0x60c   :  { %3457 = vmatprep.subr.bf16.mxu1 %v4016_v33 }
 0x60e   :  { %2475 = vadd.xlane.f32.xlu1 %v2474_v21 }
 0x620   :  { %2566 = vperm.xlu0 %3795, %v2561_v10   ;;  %v2562_v10 = vld [vmem:[%s5336_s10 + $0x8] sm:$0xff] }
 0x697   :  { %v2472_v60 = vpop.xlane.xlu0 %2471  ;;  %v2470_v52 = vpop.xlane.xlu1 %2469 }
 0x698   :  { %v2478_v61 = vmul.f32 0.0078125, %v2472_v60  ;;  %v2477_v14 = vmul.f32 0.0078125, %v2470_v52  ;;  %v3948_v60 = vld [vmem:[%s5329_s3 + $0x48] sm:$0xff]   ;;  %v3949_v52 = vld [vmem:[%s5329_s3 + $0x50] sm:$0xff]  }
 0x699   :  { %3458 = vmatpush3.bf16.msra.mxu1 %v3948_v60  ;;  %v3970_v60 = vld [vmem:[%s5329_s3 + $0xb8] sm:$0xff]  }
 0x69a   :  { %v2481_v42 = vmul.f32 %v2478_v61, %v5092_v40  ;;  %v2480_v44 = vmul.f32 %v2477_v14, %v5097_v28  ;;  %3459 = vmatprep.subr.bf16.mxu1 %v4016_v33  ;;  %v3950_v61 = vld [vmem:[%s5329_s3 + $0x58] sm:$0xff]   ;;  %v3951_v14 = vld [vmem:[%s5329_s3 + $0x60] sm:$0xff]  }
 0x69b   :  { %v2476_v6 = vpop.xlane.xlu1 %2475 }
 0x69c   :  { %v2479_v39 = vmul.f32 0.0078125, %v2476_v6  ;;  %v2483_v0 = vadd.f32 %v2481_v42, %v2480_v44  ;;  %v3952_v42 = vld [vmem:[%s5329_s3 + $0x68] sm:$0xff]   ;;  %v3953_v44 = vld [vmem:[%s5329_s3 + $0x70] sm:$0xff]   ;;  %v3954_v6 = vld [vmem:[%s5329_s3 + $0x78] sm:$0xff]  }
 0x69d   :  { %3460 = vmatpush3.bf16.msra.mxu1 %v3949_v52  ;;  %v3971_v52 = vld [vmem:[%s5329_s3 + $0xc0] sm:$0xff]  }
 0x69e   :  { %v2482_v36 = vmul.f32 %v2479_v39, %v5102_v45  ;;  %3461 = vmatprep.subr.bf16.mxu1 %v4016_v33 }
 0x69f   :  { %v2567_v39 = vpop.permute.xlu0 %2566 }
 0x6a0   :  { %v2484_v34 = vsel %vm116_vm2, %v2482_v36, 0.0 }
 0x6a1   :  { %v2485_v3 = vadd.f32 %v2484_v34, %v2483_v0  ;;  %3462 = vmatpush3.bf16.msra.mxu1 %v3950_v61  ;;  %v3972_v61 = vld [vmem:[%s5329_s3 + $0xc8] sm:$0xff]  }
 0x6a2   :  { %3463 = vmatprep.subr.bf16.mxu1 %v4016_v33 }
 0x6a3   :  { %v2486_v47 = vrot.slane %v2485_v3, 4 }
 0x6a5   :  { %v2487_v37 = vadd.f32 %v2486_v47, %v2485_v3  ;;  %3464 = vmatpush3.bf16.msra.mxu1 %v3951_v14  ;;  %v3973_v14 = vld [vmem:[%s5329_s3 + $0xd0] sm:$0xff]  }
 0x6a6   :  { %3465 = vmatprep.subr.bf16.mxu1 %v4016_v33 }
 0x6a7   :  { %v2488_v4 = vrot.slane %v2487_v37, 2 }
 0x6a9   :  { %v2489_v23 = vadd.f32 %v2488_v4, %v2487_v37  ;;  %3466 = vmatpush3.bf16.msra.mxu1 %v3952_v42  ;;  %v3974_v42 = vld [vmem:[%s5329_s3 + $0xd8] sm:$0xff]  }
 0x6aa   :  { %3467 = vmatprep.subr.bf16.mxu1 %v4016_v33 }
 0x6ab   :  { %v2490_v48 = vrot.slane %v2489_v23, 1 }
 0x6ad   :  { %v2491_v7 = vadd.f32 %v2490_v48, %v2489_v23  ;;  %3468 = vmatpush3.bf16.msra.mxu1 %v3953_v44  ;;  %v3975_v44 = vld [vmem:[%s5329_s3 + $0xe0] sm:$0xff]  }
 0x6ae   :  { %3469 = vmatprep.subr.bf16.mxu1 %v4016_v33 }
 0x6af   :  { %v5115_v18 = vsub.f32 %v2450_v12, %v2491_v7  ;;  %v5117_v38 = vsub.f32 %v2451_v15, %v2491_v7  ;;  %v5119_v5 = vsub.f32 %v2452_v16, %v2491_v7  ;;  %v5121_v46 = vsub.f32 %v2453_v43, %v2491_v7  ;;  %v2522_v43 = vld [vmem:[%s5335_s9] sm:$0xff] }
 0x6b1   :  { %v2496_v19 = vmul.f32 %v5115_v18, %v5115_v18  ;;  %v2497_v8 = vmul.f32 %v5117_v38, %v5117_v38  ;;  %v2498_v50 = vmul.f32 %v5119_v5, %v5119_v5  ;;  %v2499_v35 = vmul.f32 %v5121_v46, %v5121_v46  ;;  %3470 = vmatpush3.bf16.msra.mxu1 %v3954_v6  ;;  %v3976_v6 = vld [vmem:[%s5329_s3 + $0xe8] sm:$0xff]  }
 0x6b2   :  { %3475 = vmatprep.subr.bf16.mxu1 %v4016_v33 }
 0x6b3   :  { %v2500_v1 = vadd.f32 %v2497_v8, %v2496_v19 }
 0x6b5   :  { %v2501_v51 = vadd.f32 %v2500_v1, %v2498_v50  ;;  %v2579_v50 = vmul.f32 %v2567_v39, %v5097_v28  ;;  %v3977_v39 = vld [vmem:[%s5329_s3 + $0xf0] sm:$0xff]  }
 0x6b7   :  { %v2502_v22 = vadd.f32 %v2501_v51, %v2499_v35 }
 0x6b9   :  { %v2503_v62 = vrot.slane %v2502_v22, 4 }
 0x6bb   :  { %v2504_v20 = vadd.f32 %v2503_v62, %v2502_v22 }
 0x6bd   :  { %v2505_v2 = vrot.slane %v2504_v20, 2 }
 0x6bf   :  { %v2506_v9 = vadd.f32 %v2505_v2, %v2504_v20 }
 0x6c1   :  { %v2507_v13 = vrot.slane %v2506_v9, 1 }
 0x6c3   :  { %v2508_v27 = vadd.f32 %v2507_v13, %v2506_v9 }
 0x6c5   :  { %v2509_v53 = vmul.f32 %v2508_v27, %v5097_v28  ;;  %v2510_v63 = vmul.f32 %v2508_v27, %v5092_v40  ;;  %v2511_v32 = vmul.f32 %v2508_v27, %v5102_v45 }
 0x6c7   :  { %2512 = vadd.xlane.f32.xlu1 %v2509_v53  ;;  %v2516_v11 = vsel %vm116_vm2, %v2511_v32, 0.0 }
 0x6cb   :  { %2514 = vadd.xlane.f32.xlu1 %v2510_v63 }
 0x6cf   :  { %2517 = vadd.xlane.f32.xlu1 %v2516_v11 }
 0x754   :  { %v2513_v54 = vpop.xlane.xlu1 %2512 }
 0x755   :  { %v2519_v15 = vmul.f32 0.0078125, %v2513_v54 }
 0x757   :  { %v2525_v55 = vadd.f32 1e-05, %v2519_v15 }
 0x758   :  { %v2515_v12 = vpop.xlane.xlu1 %2514 }
 0x759   :  { %3983 = vrsqrt.f32 %v2525_v55  ;;  %v2520_v16 = vmul.f32 0.0078125, %v2515_v12 }
 0x75b   :  { %v2526_v41 = vadd.f32 1e-05, %v2520_v16 }
 0x75c   :  { %v2518_v25 = vpop.xlane.xlu1 %2517 }
 0x75d   :  { %3985 = vrsqrt.f32 %v2526_v41  ;;  %v2521_v24 = vmul.f32 0.0078125, %v2518_v25 }
 0x75f   :  { %v2527_v58 = vadd.f32 1e-05, %v2521_v24 }
 0x761   :  { %3987 = vrsqrt.f32 %v2527_v58 }
 0x763   :  { %v3984_v56 = vpop.eup %3983 }
 0x764   :  { %v2531_v30 = vmul.f32 %v3984_v56, %v2522_v43  ;;  %v3955_v43 = vld [vmem:[%s5329_s3] sm:$0xff]  }
 0x766   :  { %2536 = vperm.xlu0 %3795, %v2531_v30   ;;  %v3960_v30 = vld [vmem:[%s5329_s3 + $0x28] sm:$0xff]  }
 0x767   :  { %v3986_v17 = vpop.eup %3985 }
 0x768   :  { %v2532_v59 = vmul.f32 %v3986_v17, %v2523_v26  ;;  %v3961_v26 = vld [vmem:[%s5329_s3 + $0x30] sm:$0xff]   ;;  %v3962_v17 = vld [vmem:[%s5329_s3 + $0x38] sm:$0xff]  }
 0x76a   :  { %2576 = vperm.xlu0 %3795, %v2563_v57   ;;  %2541 = vperm.xlu1 %3796, %v2532_v59   ;;  %v3963_v57 = vld [vmem:[%s5329_s3 + $0x80] sm:$0xff]   ;;  %v3964_v59 = vld [vmem:[%s5329_s3 + $0x88] sm:$0xff]  }
 0x76b   :  { %v3988_v49 = vpop.eup %3987 }
 0x76c   :  { %v2533_v21 = vmul.f32 %v3988_v49, %v2524_v29  ;;  %v3965_v29 = vld [vmem:[%s5329_s3 + $0x90] sm:$0xff]   ;;  %v3966_v49 = vld [vmem:[%s5329_s3 + $0x98] sm:$0xff]  }
 0x76e   :  { %2546 = vperm.xlu1 %3796, %v2533_v21   ;;  %v3968_v21 = vld [vmem:[%s5329_s3 + $0xa8] sm:$0xff]  }
 0x772   :  { %2571 = vperm.xlu1 %3796, %v2562_v10   ;;  %v3969_v10 = vld [vmem:[%s5329_s3 + $0xb0] sm:$0xff]  }
 0x7e5   :  { %v2537_v36 = vpop.permute.xlu0 %2536 }
 0x7e6   :  { %v2549_v3 = vmul.f32 %v2537_v36, %v5097_v28  ;;  %v3978_v36 = vld [vmem:[%s5329_s3 + $0xf8] sm:$0xff]  }
 0x7e9   :  { %v2542_v0 = vpop.permute.xlu1 %2541  ;;  %v2577_v37 = vpop.permute.xlu0 %2576 }
 0x7ea   :  { %v2550_v34 = vmul.f32 %v2542_v0, %v5092_v40  ;;  %v2581_v7 = vmul.f32 %v2577_v37, %v5102_v45 }
 0x7ec   :  { %v2552_v23 = vadd.f32 %v2550_v34, %v2549_v3  ;;  %v2583_v22 = vsel %vm116_vm2, %v2581_v7, 0.0 }
 0x7ed   :  { %v2547_v47 = vpop.permute.xlu1 %2546 }
 0x7ee   :  { %v2551_v4 = vmul.f32 %v2547_v47, %v5102_v45 }
 0x7f0   :  { %v2553_v48 = vsel %vm116_vm2, %v2551_v4, 0.0 }
 0x7f1   :  { %v2554_v19 = vadd.f32 %v2553_v48, %v2552_v23  ;;  %v2572_v8 = vpop.permute.xlu1 %2571 }
 0x7f2   :  { %v2580_v1 = vmul.f32 %v2572_v8, %v5092_v40 }
 0x7f3   :  { %v2555_v35 = vrot.slane %v2554_v19, 4 }
 0x7f4   :  { %v2582_v51 = vadd.f32 %v2580_v1, %v2579_v50 }
 0x7f5   :  { %v2556_v62 = vadd.f32 %v2555_v35, %v2554_v19 }
 0x7f6   :  { %v2584_v20 = vadd.f32 %v2583_v22, %v2582_v51 }
 0x7f7   :  { %v2557_v2 = vrot.slane %v2556_v62, 2 }
 0x7f8   :  { %v2585_v9 = vrot.slane %v2584_v20, 4 }
 0x7f9   :  { %v2558_v13 = vadd.f32 %v2557_v2, %v2556_v62 }
 0x7fa   :  { %v2586_v27 = vadd.f32 %v2585_v9, %v2584_v20 }
 0x7fb   :  { %v2559_v53 = vrot.slane %v2558_v13, 1 }
 0x7fc   :  { %v2587_v63 = vrot.slane %v2586_v27, 2 }
 0x7fd   :  { %v2560_v32 = vadd.f32 %v2559_v53, %v2558_v13 }
 0x7fe   :  { %v2588_v45 = vadd.f32 %v2587_v63, %v2586_v27 }
 0x7ff   :  { %v2591_v54 = vmul.f32 %v2560_v32, %v5115_v18  ;;  %v2592_v28 = vmul.f32 %v2560_v32, %v5117_v38  ;;  %v2593_v15 = vmul.f32 %v2560_v32, %v5119_v5  ;;  %v2594_v55 = vmul.f32 %v2560_v32, %v5121_v46  ;;  %v3956_v18 = vld [vmem:[%s5329_s3 + $0x8] sm:$0xff]   ;;  %v3957_v38 = vld [vmem:[%s5329_s3 + $0x10] sm:$0xff]   ;;  %v3958_v5 = vld [vmem:[%s5329_s3 + $0x18] sm:$0xff]  }
 0x800   :  { %v2589_v11 = vrot.slane %v2588_v45, 1  ;;  %v3959_v46 = vld [vmem:[%s5329_s3 + $0x20] sm:$0xff]  }
 0x802   :  { %v2590_v40 = vadd.f32 %v2589_v11, %v2588_v45 }
 0x804   :  { %v2595_v12 = vadd.f32 %v2591_v54, %v2590_v40  ;;  %v2596_v16 = vadd.f32 %v2592_v28, %v2590_v40  ;;  %v2597_v41 = vadd.f32 %v2593_v15, %v2590_v40  ;;  %v2598_v25 = vadd.f32 %v2594_v55, %v2590_v40 }
 0x806   :  { %v2599_v24 = vpack.c.bf16 %v2596_v16, %v2595_v12  ;;  %v5197_v58 = vpack.c.bf16 %v2598_v25, %v2597_v41 }
 0x808   :  { %v2635_v56 = vrot.slane %v2599_v24, 4  ;;  %v2937_v0 = vrot.slane %v5197_v58, 4 }
 0x80a   :  { %3472 = vmatmul.mubr.bf16.vlgmr.msra.gmra.mrb[64].mxu1 %v2635_v56 }
 0x80b   :  { %3476 = vmatpush3.bf16.msra.mxu1 %v3955_v43  ;;  %3491 = vmatprep.mubr.msk.bf16.mxu1 %vm4017_vm4, %v4016_v33 }
 0x80c   :  { %3477 = vmatprep.subr.bf16.mxu1 %v4016_v33 }
 0x80f   :  { %3478 = vmatpush3.bf16.msra.mxu1 %v3956_v18 }
 0x810   :  { %3479 = vmatprep.subr.bf16.mxu1 %v4016_v33 }
 0x813   :  { %3480 = vmatpush3.bf16.msra.mxu1 %v3957_v38  ;;  %v3061_v38 = vlaneseq }
 0x814   :  { %3481 = vmatprep.subr.bf16.mxu1 %v4016_v33 }
 0x817   :  { %3482 = vmatpush3.bf16.msra.mxu1 %v3958_v5  ;;  %v3062_v5 = vshrl.u32 %v3061_v38, 7 }
 0x818   :  { %3483 = vmatprep.subr.bf16.mxu1 %v4016_v33 }
 0x81b   :  { %3484 = vmatpush3.bf16.msra.mxu1 %v3959_v46  ;;  %v3056_v46 = vld [vmem:[%s5337_s11] sm:$0x1] }
 0x81c   :  { %3485 = vmatprep.subr.bf16.mxu1 %v4016_v33 }
 0x81f   :  { %3486 = vmatpush3.bf16.msra.mxu1 %v3960_v30  ;;  %v3063_v30 = vsub.s32 0, %v3062_v5 }
 0x820   :  { %3487 = vmatprep.subr.bf16.mxu1 %v4016_v33 }
 0x823   :  { %3488 = vmatpush3.bf16.msra.mxu1 %v3961_v26 }
 0x824   :  { %3489 = vmatprep.subr.bf16.mxu1 %v4016_v33 }
 0x827   :  { %3490 = vmatpush3.bf16.msra.mxu1 %v3962_v17 }
 0x828   :  { %3495 = vmatprep.subr.bf16.mxu1 %v4016_v33 }
 0x82a   :  { %3492 = vmatmul.mubr.bf16.vlgmr.msra.gmra.mrb[68].mxu1 %v2599_v24 }
 0x82b   :  { %3496 = vmatpush3.bf16.msra.mxu1 %v3963_v57  ;;  %3511 = vmatprep.mubr.msk.bf16.mxu1 %vm4017_vm4, %v4016_v33 }
 0x82c   :  { %3497 = vmatprep.subr.bf16.mxu1 %v4016_v33 }
 0x82f   :  { %3498 = vmatpush3.bf16.msra.mxu1 %v3964_v59  ;;  %v3418_v59 = vld [vmem:[%s5338_s12] ss:$0 sm:$0xff] }
 0x830   :  { %3499 = vmatprep.subr.bf16.mxu1 %v4016_v33 }
 0x833   :  { %3500 = vmatpush3.bf16.msra.mxu1 %v3965_v29 }
 0x834   :  { %3501 = vmatprep.subr.bf16.mxu1 %v4016_v33 }
 0x837   :  { %3502 = vmatpush3.bf16.msra.mxu1 %v3966_v49 }
 0x838   :  { %3503 = vmatprep.subr.bf16.mxu1 %v4016_v33 }
 0x83b   :  { %3504 = vmatpush3.bf16.msra.mxu1 %v3967_v31 }
 0x83c   :  { %3505 = vmatprep.subr.bf16.mxu1 %v4016_v33 }
 0x83f   :  { %3506 = vmatpush3.bf16.msra.mxu1 %v3968_v21 }
 0x840   :  { %3507 = vmatprep.subr.bf16.mxu1 %v4016_v33 }
 0x843   :  { %3508 = vmatpush3.bf16.msra.mxu1 %v3969_v10 }
 0x844   :  { %3509 = vmatprep.subr.bf16.mxu1 %v4016_v33 }
 0x847   :  { %3510 = vmatpush3.bf16.msra.mxu1 %v3970_v60 }
 0x848   :  { %3515 = vmatprep.subr.bf16.mxu1 %v4016_v33 }
 0x84a   :  { %3512 = vmatmul.mubr.bf16.vlgmr.msra.gmra.mrb[72].mxu1 %v5197_v58 }
 0x84b   :  { %3516 = vmatpush3.bf16.msra.mxu1 %v3971_v52  ;;  %3531 = vmatprep.mubr.msk.bf16.mxu1 %vm4017_vm4, %v4016_v33 }
 0x84c   :  { %3517 = vmatprep.subr.bf16.mxu1 %v4016_v33 }
 0x84f   :  { %3518 = vmatpush3.bf16.msra.mxu1 %v3972_v61 }
 0x850   :  { %3519 = vmatprep.subr.bf16.mxu1 %v4016_v33 }
 0x853   :  { %3520 = vmatpush3.bf16.msra.mxu1 %v3973_v14 }
 0x854   :  { %3521 = vmatprep.subr.bf16.mxu1 %v4016_v33 }
 0x857   :  { %3522 = vmatpush3.bf16.msra.mxu1 %v3974_v42 }
 0x858   :  { %3523 = vmatprep.subr.bf16.mxu1 %v4016_v33 }
 0x85b   :  { %3524 = vmatpush3.bf16.msra.mxu1 %v3975_v44 }
 0x85c   :  { %3525 = vmatprep.subr.bf16.mxu1 %v4016_v33 }
 0x85f   :  { %3526 = vmatpush3.bf16.msra.mxu1 %v3976_v6 }
 0x860   :  { %3527 = vmatprep.subr.bf16.mxu1 %v4016_v33 }
 0x863   :  { %3528 = vmatpush3.bf16.msra.mxu1 %v3977_v39 }
 0x864   :  { %3529 = vmatprep.subr.bf16.mxu1 %v4016_v33  ;;  %v3417_v33 = vld [vmem:[%s5332_s6] ss:$0 sm:$0xff] }
 0x867   :  { %3530 = vmatpush3.bf16.msra.mxu1 %v3978_v36 }
 0x86a   :  { %3532 = vmatmul.mubr.bf16.vlgmr.msra.gmra.mrb[76].mxu1 %v2937_v0 }
 0x8dd   :  { %v2719_v34 = vpop.f32.mrb[64].mxu1 }
 0x8de   :  { %v3473_v3 = vpop.f32.mrb[65].mxu1 }
 0x8df   :  { %v2722_v47 = vpop.f32.mrb[66].mxu1 }
 0x8e0   :  { %v3474_v37 = vpop.f32.mrb[67].mxu1 }
 0x8fd   :  { %v2807_v4 = vpop.f32.mrb[68].mxu1 }
 0x8fe   :  { %v2808_v23 = vadd.f32 %v2807_v4, %v2719_v34  ;;  %v3493_v48 = vpop.f32.mrb[69].mxu1 }
 0x8ff   :  { %v2810_v7 = vpop.f32.mrb[70].mxu1 }
 0x900   :  { %v3494_v19 = vpop.f32.mrb[71].mxu1 }
 0x91d   :  { %v2912_v8 = vpop.f32.mrb[72].mxu1 }
 0x91e   :  { %v2918_v50 = vadd.f32 %v2912_v8, %v2808_v23  ;;  %v3513_v1 = vpop.f32.mrb[73].mxu1 }
 0x91f   :  { %v2915_v35 = vpop.f32.mrb[74].mxu1 }
 0x920   :  { %v3514_v51 = vpop.f32.mrb[75].mxu1 }
 0x93d   :  { %v3021_v22 = vpop.f32.mrb[76].mxu1 }
 0x93e   :  { %v3027_v62 = vadd.f32 %v3021_v22, %v2918_v50  ;;  %v3533_v20 = vpop.f32.mrb[77].mxu1 }
 0x93f   :  { %v3024_v2 = vpop.f32.mrb[78].mxu1 }
 0x940   :  { %v3035_v9 = vadd.f32 %v3417_v33, %v3027_v62  ;;  %v3534_v13 = vpop.f32.mrb[79].mxu1 }
 0x942   :  { %v3036_v27 = vmax.f32 %v3035_v9, 0.0 }
 0x944   :  { %v3038_v53 = vsel %vm3037_vm5, %v3036_v27, 0.0 }
 0x945   :  { %v3039_v63 = vrot.slane %v3038_v53, 4 }
 0x947   :  { %v3040_v32 = vadd.f32 %v3039_v63, %v3038_v53 }
 0x949   :  { %v3041_v45 = vrot.slane %v3040_v32, 2 }
 0x94b   :  { %v3042_v11 = vadd.f32 %v3041_v45, %v3040_v32 }
 0x94d   :  { %v3043_v54 = vrot.slane %v3042_v11, 1 }
 0x94f   :  { %v3044_v28 = vadd.f32 %v3043_v54, %v3042_v11 }
 0x951   :  { %v3045_v40 = vmul.f32 0.125, %v3044_v28 }
 0x953   :  { %v3046_v15 = vsub.f32 %v3036_v27, %v3045_v40 }
 0x955   :  { %v3047_v55 = vmul.f32 %v3046_v15, %v3046_v15 }
 0x957   :  { %v3048_v12 = vsel %vm3037_vm5, %v3047_v55, 0.0 }
 0x958   :  { %v3049_v16 = vrot.slane %v3048_v12, 4 }
 0x95a   :  { %v3050_v41 = vadd.f32 %v3049_v16, %v3048_v12 }
 0x95c   :  { %v3051_v25 = vrot.slane %v3050_v41, 2 }
 0x95e   :  { %v3052_v24 = vadd.f32 %v3051_v25, %v3050_v41 }
 0x960   :  { %v3053_v58 = vrot.slane %v3052_v24, 1 }
 0x962   :  { %v3054_v43 = vadd.f32 %v3053_v58, %v3052_v24 }
 0x964   :  { %v3055_v56 = vmul.f32 0.125, %v3054_v43 }
 0x966   :  { %v3057_v18 = vadd.f32 1e-05, %v3055_v56 }
 0x968   :  { %3989 = vrsqrt.f32 %v3057_v18 }
 0x972   :  { %v3990_v26 = vpop.eup %3989 }
 0x973   :  { %v3059_v17 = vmul.f32 %v3990_v26, %v3056_v46 }
 0x975   :  { %v3064_v57 = vrot.slane %v3059_v17, %v3063_v30 }
 0x977   :  { %v3066_v29 = vmul.f32 %v3064_v57, %v3046_v15 }
 0x979   :  { %v3074_v49 = vadd.f32 %v3418_v59, %v3066_v29 }
 0x97b   :  { %3075 = vst.msk [vmem:[#allocation2] sm:$0xff] %vm3037_vm5, %v3074_v49 }
 0x97c   :  { %4002 = shalt.err (!%p3999_p4)
}
 0x97d   :  { %s4003_s0 = scalar_lea.hbm %s5341_s15, 128 }
 0x97e   :  { %p4004_p5 = scmp.ne.s32.totalorder %s5341_s15, %s4003_s0  ;;  %p4007_p6 = scmp.lt.u32.totalorder %s4003_s0, %s5341_s15 }
 0x980   :  { %p4009_p7 = pnand %p4007_p6, %p4004_p5 }
 0x982   :  { %4012 = shalt.err (!%p4009_p7)
}
 0x983   :  { %3085 = dma.vmem_to_hbm [thread:$0]  %s3083_s20, 128, %s5341_s15, [#allocation3]  }
 0x984   :  { %4013 = dma.done.wait [#allocation3], 128  }
 0x985   :  { %4014 = vsyncadd [#allocation3], 4294967168 }
 0x986   :  { %3089 = vsyncpa [#allocation3], 1 }

</bundles_post_ra>
